<compile_context>
chip_gen: v5e
topology: v5e:2x2
jax: 0.10.0
libtpu: 0.0.40
codegen_flags: <defaults>
</compile_context>

<pallas_src>
import jax
import jax.numpy as jnp
from jax import lax
from jax.experimental import pallas as pl
from jax.experimental.pallas import tpu as pltpu
import numpy as np

KSIZE = 7
PAD = KSIZE // 2


def _shift_lanes(m, d):
    """Zero-filled shift along the last axis: out[..., p] = m[..., p + d] (static d)."""
    if d == 0:
        return m
    L = m.shape[-1]
    if abs(d) >= L:
        return jnp.zeros_like(m)
    zeros = jnp.zeros(m.shape[:-1] + (abs(d),), m.dtype)
    if d > 0:
        return jnp.concatenate([m[..., d:], zeros], axis=-1)
    return jnp.concatenate([zeros, m[..., :L + d]], axis=-1)


def _make_kernel(W, ksize, nb):
    pad = ksize // 2

    def kernel(x_ref, w_ref, cmask_ref, o_ref):
        # x_ref    : (nb, C, H*W)      VMEM, lane-dense input block
        # w_ref    : (2*ksize*ksize,)  SMEM, flat conv weight (OIHW order, O=1)
        # cmask_ref: (ksize, H*W)      VMEM, column-validity masks per horiz. tap
        # o_ref    : (nb, C, H*W)      VMEM, lane-dense output block
        @pl.loop(0, nb)
        def _(b):
            xb = x_ref[b].astype(jnp.float32)               # (C, HW), read once
            avg = jnp.mean(xb, axis=0, keepdims=True)       # (1, HW)
            mx = jnp.max(xb, axis=0, keepdims=True)         # (1, HW)

            acc = jnp.zeros(avg.shape, jnp.float32)
            for c, m in enumerate((avg, mx)):
                # Column-shifted / border-masked copies, reused for every row tap.
                cols = []
                for kw in range(ksize):
                    dw = kw - pad
                    s = _shift_lanes(m, dw)
                    if dw != 0:
                        s = s * cmask_ref[kw]
                    cols.append(s)
                # Per vertical offset: weighted sum of the column shifts, then a
                # single whole-row (dh * W lanes) zero-filled shift.
                for kh in range(ksize):
                    dh = kh - pad
                    base = c * ksize * ksize + kh * ksize
                    row = w_ref[base] * cols[0]
                    for kw in range(1, ksize):
                        row = row + w_ref[base + kw] * cols[kw]
                    acc = acc + _shift_lanes(row, dh * W)

            attn = jax.nn.sigmoid(acc)                      # (1, HW)
            o_ref[b] = (attn * xb).astype(o_ref.dtype)      # broadcast over C

    return kernel


def spatial_attention(x, w, *, max_block_bytes=1 << 20):
    """x: (N, C, H, W); w: (2, k, k) weight of Conv2d(2, 1, k, padding=k//2, bias=False)."""
    N, C, H, W = x.shape
    assert w.shape[0] == 2 and w.shape[1] == w.shape[2], "weight must be (2, k, k)"
    ksize = int(w.shape[1])
    pad = ksize // 2
    HW = H * W

    # Batch folding: biggest divisor of N whose input slab stays <= max_block_bytes.
    per_sample = C * HW * x.dtype.itemsize
    nb = 1
    for d in range(1, N + 1):
        if N % d == 0 and d * per_sample <= max_block_bytes:
            nb = d
    grid = (N // nb,)
    # TODO(synk): for very large per-sample slabs (several MiB), tile C (reduction
    # phase + multiply phase) or H with a 3-row halo to fit v7x's 64 MiB VMEM with
    # double buffering and to expose a second parallel axis for its 2 TCs.

    x_flat = x.reshape(N, C, HW)
    w_flat = jnp.asarray(w, jnp.float32).reshape(-1)        # (2*k*k,) -> SMEM

    # Host-precomputed column-validity masks: mask[kw, p] = 1 iff the horizontal
    # tap offset (kw - pad) stays inside the same image row (zero padding else).
    col = np.arange(HW, dtype=np.int64) % W
    cmask_np = np.stack(
        [((col + (kw - pad) >= 0) & (col + (kw - pad) < W)).astype(np.float32)
         for kw in range(ksize)], axis=0)
    cmask = jnp.asarray(cmask_np)                           # (ksize, HW)

    out_flat = pl.pallas_call(
        _make_kernel(W, ksize, nb),
        out_shape=jax.ShapeDtypeStruct((N, C, HW), x.dtype),
        grid=grid,
        in_specs=[
            pl.BlockSpec((nb, C, HW), lambda n: (n, 0, 0)),
            pl.BlockSpec(memory_space=pltpu.MemorySpace.SMEM),
            pl.BlockSpec((ksize, HW), lambda n: (0, 0)),
        ],
        out_specs=pl.BlockSpec((nb, C, HW), lambda n: (n, 0, 0)),
        compiler_params=pltpu.CompilerParams(
            dimension_semantics=("parallel",)),
    )(x_flat, w_flat, cmask)
    return out_flat.reshape(N, C, H, W)


def spatial_attention_ref(x, w):
    """Pure-JAX reference mirroring the PyTorch forward exactly."""
    avg = jnp.mean(x, axis=1, keepdims=True)
    mx = jnp.max(x, axis=1, keepdims=True)
    cat = jnp.concatenate([avg, mx], axis=1)                # (N, 2, H, W)
    k = w.shape[-1]
    p = k // 2
    out = lax.conv_general_dilated(
        cat, w.reshape(1, 2, k, k),
        window_strides=(1, 1), padding=((p, p), (p, p)),
        dimension_numbers=("NCHW", "OIHW", "NCHW"))         # (N, 1, H, W)
    return jax.nn.sigmoid(out) * x


if __name__ == "__main__":
    key = jax.random.PRNGKey(0)
    kx, kw_key = jax.random.split(key)

    N, C, H, W = 2, 4, 16, 16
    x = jax.random.normal(kx, (N, C, H, W), dtype=jnp.float32)

    # PyTorch Conv2d default init: U(-b, b), b = 1/sqrt(fan_in), fan_in = 2*k*k.
    fan_in = 2 * KSIZE * KSIZE
    bound = 1.0 / np.sqrt(fan_in)
    w = jax.random.uniform(kw_key, (2, KSIZE, KSIZE), dtype=jnp.float32,
                           minval=-bound, maxval=bound)

    out = spatial_attention(x, w)
    jax.block_until_ready(out)

    ref = spatial_attention_ref(x, w)
    np.testing.assert_allclose(np.asarray(out), np.asarray(ref),
                               rtol=1e-5, atol=1e-5)
    print("KERNEL_OK")
</pallas_src>

<mosaic_0001>
module attributes {stable_mosaic.version = 11 : i64} {
  func.func @kernel(%arg0: i32, %arg1: memref<2x4x256xf32, #tpu.memory_space<vmem>>, %arg2: memref<98xf32, #tpu.memory_space<smem>>, %arg3: memref<7x256xf32, #tpu.memory_space<vmem>>, %arg4: memref<2x4x256xf32, #tpu.memory_space<vmem>>) attributes {dimension_semantics = [#tpu.dimension_semantics<parallel>], iteration_bounds = array<i64: 1>, scalar_prefetch = 0 : i64, scratch_operands = 0 : i64, tpu.core_type = #tpu.core_type<tc>, window_params = [{transform_indices = @transform_0, window_bounds = array<i64: 2, 4, 256>}, {transform_indices = @transform_1, window_bounds = array<i64: 98>}, {pipeline_mode = #tpu.pipeline_mode<synchronous>, transform_indices = @transform_2, window_bounds = array<i64: 7, 256>}, {transform_indices = @transform_3, window_bounds = array<i64: 2, 4, 256>}]} {
    %c0_i32 = arith.constant 0 : i32
    %c2_i32 = arith.constant 2 : i32
    %0 = arith.addi %c0_i32, %c2_i32 : i32
    %c1_i32 = arith.constant 1 : i32
    scf.for %arg5 = %c0_i32 to %0 step %c1_i32  : i32 {
      %c1_i32_1 = arith.constant 1 : i32
      %1 = arith.muli %arg5, %c1_i32_1 : i32
      %c0_i32_2 = arith.constant 0 : i32
      %2 = arith.addi %c0_i32_2, %1 : i32
      %3 = arith.index_cast %2 : i32 to index
      %c0 = arith.constant 0 : index
      %c0_3 = arith.constant 0 : index
      %4 = vector.load %arg1[%3, %c0, %c0_3] : memref<2x4x256xf32, #tpu.memory_space<vmem>>, vector<1x4x256xf32>
      %5 = vector.shape_cast %4 : vector<1x4x256xf32> to vector<4x256xf32>
      %cst = arith.constant dense<0.000000e+00> : vector<256xf32>
      %6 = vector.multi_reduction <add>, %5, %cst [0] : vector<4x256xf32> to vector<256xf32>
      %7 = vector.shape_cast %6 : vector<256xf32> to vector<1x256xf32>
      %cst_4 = arith.constant 4.000000e+00 : f32
      %8 = vector.broadcast %cst_4 : f32 to vector<1x256xf32>
      %9 = arith.divf %7, %8 : vector<1x256xf32>
      %cst_5 = arith.constant dense<0xFF800000> : vector<256xf32>
      %10 = vector.multi_reduction <maximumf>, %5, %cst_5 [0] : vector<4x256xf32> to vector<256xf32>
      %11 = vector.shape_cast %10 : vector<256xf32> to vector<1x256xf32>
      %cst_6 = arith.constant 0.000000e+00 : f32
      %12 = vector.broadcast %cst_6 : f32 to vector<1x256xf32>
      %cst_7 = arith.constant 0.000000e+00 : f32
      %13 = vector.broadcast %cst_7 : f32 to vector<1x3xf32>
      %14 = vector.extract_strided_slice %9 {offsets = [0, 0], sizes = [1, 253], strides = [1, 1]} : vector<1x256xf32> to vector<1x253xf32>
      %15 = tpu.concatenate %13, %14 in 1 : vector<1x3xf32>, vector<1x253xf32> -> vector<1x256xf32>
      %c0_8 = arith.constant 0 : index
      %c0_9 = arith.constant 0 : index
      %16 = vector.load %arg3[%c0_8, %c0_9] : memref<7x256xf32, #tpu.memory_space<vmem>>, vector<1x256xf32>
      %17 = vector.shape_cast %16 : vector<1x256xf32> to vector<256xf32>
      %18 = vector.shape_cast %17 : vector<256xf32> to vector<1x256xf32>
      %19 = arith.mulf %15, %18 : vector<1x256xf32>
      %cst_10 = arith.constant 0.000000e+00 : f32
      %20 = vector.broadcast %cst_10 : f32 to vector<1x2xf32>
      %21 = vector.extract_strided_slice %9 {offsets = [0, 0], sizes = [1, 254], strides = [1, 1]} : vector<1x256xf32> to vector<1x254xf32>
      %22 = tpu.concatenate %20, %21 in 1 : vector<1x2xf32>, vector<1x254xf32> -> vector<1x256xf32>
      %c1 = arith.constant 1 : index
      %c0_11 = arith.constant 0 : index
      %23 = vector.load %arg3[%c1, %c0_11] : memref<7x256xf32, #tpu.memory_space<vmem>>, vector<1x256xf32>
      %24 = vector.shape_cast %23 : vector<1x256xf32> to vector<256xf32>
      %25 = vector.shape_cast %24 : vector<256xf32> to vector<1x256xf32>
      %26 = arith.mulf %22, %25 : vector<1x256xf32>
      %cst_12 = arith.constant 0.000000e+00 : f32
      %27 = vector.broadcast %cst_12 : f32 to vector<1x1xf32>
      %28 = vector.extract_strided_slice %9 {offsets = [0, 0], sizes = [1, 255], strides = [1, 1]} : vector<1x256xf32> to vector<1x255xf32>
      %29 = tpu.concatenate %27, %28 in 1 : vector<1x1xf32>, vector<1x255xf32> -> vector<1x256xf32>
      %c2 = arith.constant 2 : index
      %c0_13 = arith.constant 0 : index
      %30 = vector.load %arg3[%c2, %c0_13] : memref<7x256xf32, #tpu.memory_space<vmem>>, vector<1x256xf32>
      %31 = vector.shape_cast %30 : vector<1x256xf32> to vector<256xf32>
      %32 = vector.shape_cast %31 : vector<256xf32> to vector<1x256xf32>
      %33 = arith.mulf %29, %32 : vector<1x256xf32>
      %cst_14 = arith.constant 0.000000e+00 : f32
      %34 = vector.broadcast %cst_14 : f32 to vector<1x1xf32>
      %35 = vector.extract_strided_slice %9 {offsets = [0, 1], sizes = [1, 255], strides = [1, 1]} : vector<1x256xf32> to vector<1x255xf32>
      %36 = tpu.concatenate %35, %34 in 1 : vector<1x255xf32>, vector<1x1xf32> -> vector<1x256xf32>
      %c4 = arith.constant 4 : index
      %c0_15 = arith.constant 0 : index
      %37 = vector.load %arg3[%c4, %c0_15] : memref<7x256xf32, #tpu.memory_space<vmem>>, vector<1x256xf32>
      %38 = vector.shape_cast %37 : vector<1x256xf32> to vector<256xf32>
      %39 = vector.shape_cast %38 : vector<256xf32> to vector<1x256xf32>
      %40 = arith.mulf %36, %39 : vector<1x256xf32>
      %cst_16 = arith.constant 0.000000e+00 : f32
      %41 = vector.broadcast %cst_16 : f32 to vector<1x2xf32>
      %42 = vector.extract_strided_slice %9 {offsets = [0, 2], sizes = [1, 254], strides = [1, 1]} : vector<1x256xf32> to vector<1x254xf32>
      %43 = tpu.concatenate %42, %41 in 1 : vector<1x254xf32>, vector<1x2xf32> -> vector<1x256xf32>
      %c5 = arith.constant 5 : index
      %c0_17 = arith.constant 0 : index
      %44 = vector.load %arg3[%c5, %c0_17] : memref<7x256xf32, #tpu.memory_space<vmem>>, vector<1x256xf32>
      %45 = vector.shape_cast %44 : vector<1x256xf32> to vector<256xf32>
      %46 = vector.shape_cast %45 : vector<256xf32> to vector<1x256xf32>
      %47 = arith.mulf %43, %46 : vector<1x256xf32>
      %cst_18 = arith.constant 0.000000e+00 : f32
      %48 = vector.broadcast %cst_18 : f32 to vector<1x3xf32>
      %49 = vector.extract_strided_slice %9 {offsets = [0, 3], sizes = [1, 253], strides = [1, 1]} : vector<1x256xf32> to vector<1x253xf32>
      %50 = tpu.concatenate %49, %48 in 1 : vector<1x253xf32>, vector<1x3xf32> -> vector<1x256xf32>
      %c6 = arith.constant 6 : index
      %c0_19 = arith.constant 0 : index
      %51 = vector.load %arg3[%c6, %c0_19] : memref<7x256xf32, #tpu.memory_space<vmem>>, vector<1x256xf32>
      %52 = vector.shape_cast %51 : vector<1x256xf32> to vector<256xf32>
      %53 = vector.shape_cast %52 : vector<256xf32> to vector<1x256xf32>
      %54 = arith.mulf %50, %53 : vector<1x256xf32>
      %c0_20 = arith.constant 0 : index
      %55 = memref.load %arg2[%c0_20] : memref<98xf32, #tpu.memory_space<smem>>
      %56 = vector.broadcast %55 : f32 to vector<1x256xf32>
      %57 = arith.mulf %56, %19 : vector<1x256xf32>
      %c1_21 = arith.constant 1 : index
      %58 = memref.load %arg2[%c1_21] : memref<98xf32, #tpu.memory_space<smem>>
      %59 = vector.broadcast %58 : f32 to vector<1x256xf32>
      %60 = arith.mulf %59, %26 : vector<1x256xf32>
      %61 = arith.addf %57, %60 : vector<1x256xf32>
      %c2_22 = arith.constant 2 : index
      %62 = memref.load %arg2[%c2_22] : memref<98xf32, #tpu.memory_space<smem>>
      %63 = vector.broadcast %62 : f32 to vector<1x256xf32>
      %64 = arith.mulf %63, %33 : vector<1x256xf32>
      %65 = arith.addf %61, %64 : vector<1x256xf32>
      %c3 = arith.constant 3 : index
      %66 = memref.load %arg2[%c3] : memref<98xf32, #tpu.memory_space<smem>>
      %67 = vector.broadcast %66 : f32 to vector<1x256xf32>
      %68 = arith.mulf %67, %9 : vector<1x256xf32>
      %69 = arith.addf %65, %68 : vector<1x256xf32>
      %c4_23 = arith.constant 4 : index
      %70 = memref.load %arg2[%c4_23] : memref<98xf32, #tpu.memory_space<smem>>
      %71 = vector.broadcast %70 : f32 to vector<1x256xf32>
      %72 = arith.mulf %71, %40 : vector<1x256xf32>
      %73 = arith.addf %69, %72 : vector<1x256xf32>
      %c5_24 = arith.constant 5 : index
      %74 = memref.load %arg2[%c5_24] : memref<98xf32, #tpu.memory_space<smem>>
      %75 = vector.broadcast %74 : f32 to vector<1x256xf32>
      %76 = arith.mulf %75, %47 : vector<1x256xf32>
      %77 = arith.addf %73, %76 : vector<1x256xf32>
      %c6_25 = arith.constant 6 : index
      %78 = memref.load %arg2[%c6_25] : memref<98xf32, #tpu.memory_space<smem>>
      %79 = vector.broadcast %78 : f32 to vector<1x256xf32>
      %80 = arith.mulf %79, %54 : vector<1x256xf32>
      %81 = arith.addf %77, %80 : vector<1x256xf32>
      %cst_26 = arith.constant 0.000000e+00 : f32
      %82 = vector.broadcast %cst_26 : f32 to vector<1x48xf32>
      %83 = vector.extract_strided_slice %81 {offsets = [0, 0], sizes = [1, 208], strides = [1, 1]} : vector<1x256xf32> to vector<1x208xf32>
      %84 = tpu.concatenate %82, %83 in 1 : vector<1x48xf32>, vector<1x208xf32> -> vector<1x256xf32>
      %85 = arith.addf %12, %84 : vector<1x256xf32>
      %c7 = arith.constant 7 : index
      %86 = memref.load %arg2[%c7] : memref<98xf32, #tpu.memory_space<smem>>
      %87 = vector.broadcast %86 : f32 to vector<1x256xf32>
      %88 = arith.mulf %87, %19 : vector<1x256xf32>
      %c8 = arith.constant 8 : index
      %89 = memref.load %arg2[%c8] : memref<98xf32, #tpu.memory_space<smem>>
      %90 = vector.broadcast %89 : f32 to vector<1x256xf32>
      %91 = arith.mulf %90, %26 : vector<1x256xf32>
      %92 = arith.addf %88, %91 : vector<1x256xf32>
      %c9 = arith.constant 9 : index
      %93 = memref.load %arg2[%c9] : memref<98xf32, #tpu.memory_space<smem>>
      %94 = vector.broadcast %93 : f32 to vector<1x256xf32>
      %95 = arith.mulf %94, %33 : vector<1x256xf32>
      %96 = arith.addf %92, %95 : vector<1x256xf32>
      %c10 = arith.constant 10 : index
      %97 = memref.load %arg2[%c10] : memref<98xf32, #tpu.memory_space<smem>>
      %98 = vector.broadcast %97 : f32 to vector<1x256xf32>
      %99 = arith.mulf %98, %9 : vector<1x256xf32>
      %100 = arith.addf %96, %99 : vector<1x256xf32>
      %c11 = arith.constant 11 : index
      %101 = memref.load %arg2[%c11] : memref<98xf32, #tpu.memory_space<smem>>
      %102 = vector.broadcast %101 : f32 to vector<1x256xf32>
      %103 = arith.mulf %102, %40 : vector<1x256xf32>
      %104 = arith.addf %100, %103 : vector<1x256xf32>
      %c12 = arith.constant 12 : index
      %105 = memref.load %arg2[%c12] : memref<98xf32, #tpu.memory_space<smem>>
      %106 = vector.broadcast %105 : f32 to vector<1x256xf32>
      %107 = arith.mulf %106, %47 : vector<1x256xf32>
      %108 = arith.addf %104, %107 : vector<1x256xf32>
      %c13 = arith.constant 13 : index
      %109 = memref.load %arg2[%c13] : memref<98xf32, #tpu.memory_space<smem>>
      %110 = vector.broadcast %109 : f32 to vector<1x256xf32>
      %111 = arith.mulf %110, %54 : vector<1x256xf32>
      %112 = arith.addf %108, %111 : vector<1x256xf32>
      %cst_27 = arith.constant 0.000000e+00 : f32
      %113 = vector.broadcast %cst_27 : f32 to vector<1x32xf32>
      %114 = vector.extract_strided_slice %112 {offsets = [0, 0], sizes = [1, 224], strides = [1, 1]} : vector<1x256xf32> to vector<1x224xf32>
      %115 = tpu.concatenate %113, %114 in 1 : vector<1x32xf32>, vector<1x224xf32> -> vector<1x256xf32>
      %116 = arith.addf %85, %115 : vector<1x256xf32>
      %c14 = arith.constant 14 : index
      %117 = memref.load %arg2[%c14] : memref<98xf32, #tpu.memory_space<smem>>
      %118 = vector.broadcast %117 : f32 to vector<1x256xf32>
      %119 = arith.mulf %118, %19 : vector<1x256xf32>
      %c15 = arith.constant 15 : index
      %120 = memref.load %arg2[%c15] : memref<98xf32, #tpu.memory_space<smem>>
      %121 = vector.broadcast %120 : f32 to vector<1x256xf32>
      %122 = arith.mulf %121, %26 : vector<1x256xf32>
      %123 = arith.addf %119, %122 : vector<1x256xf32>
      %c16 = arith.constant 16 : index
      %124 = memref.load %arg2[%c16] : memref<98xf32, #tpu.memory_space<smem>>
      %125 = vector.broadcast %124 : f32 to vector<1x256xf32>
      %126 = arith.mulf %125, %33 : vector<1x256xf32>
      %127 = arith.addf %123, %126 : vector<1x256xf32>
      %c17 = arith.constant 17 : index
      %128 = memref.load %arg2[%c17] : memref<98xf32, #tpu.memory_space<smem>>
      %129 = vector.broadcast %128 : f32 to vector<1x256xf32>
      %130 = arith.mulf %129, %9 : vector<1x256xf32>
      %131 = arith.addf %127, %130 : vector<1x256xf32>
      %c18 = arith.constant 18 : index
      %132 = memref.load %arg2[%c18] : memref<98xf32, #tpu.memory_space<smem>>
      %133 = vector.broadcast %132 : f32 to vector<1x256xf32>
      %134 = arith.mulf %133, %40 : vector<1x256xf32>
      %135 = arith.addf %131, %134 : vector<1x256xf32>
      %c19 = arith.constant 19 : index
      %136 = memref.load %arg2[%c19] : memref<98xf32, #tpu.memory_space<smem>>
      %137 = vector.broadcast %136 : f32 to vector<1x256xf32>
      %138 = arith.mulf %137, %47 : vector<1x256xf32>
      %139 = arith.addf %135, %138 : vector<1x256xf32>
      %c20 = arith.constant 20 : index
      %140 = memref.load %arg2[%c20] : memref<98xf32, #tpu.memory_space<smem>>
      %141 = vector.broadcast %140 : f32 to vector<1x256xf32>
      %142 = arith.mulf %141, %54 : vector<1x256xf32>
      %143 = arith.addf %139, %142 : vector<1x256xf32>
      %cst_28 = arith.constant 0.000000e+00 : f32
      %144 = vector.broadcast %cst_28 : f32 to vector<1x16xf32>
      %145 = vector.extract_strided_slice %143 {offsets = [0, 0], sizes = [1, 240], strides = [1, 1]} : vector<1x256xf32> to vector<1x240xf32>
      %146 = tpu.concatenate %144, %145 in 1 : vector<1x16xf32>, vector<1x240xf32> -> vector<1x256xf32>
      %147 = arith.addf %116, %146 : vector<1x256xf32>
      %c21 = arith.constant 21 : index
      %148 = memref.load %arg2[%c21] : memref<98xf32, #tpu.memory_space<smem>>
      %149 = vector.broadcast %148 : f32 to vector<1x256xf32>
      %150 = arith.mulf %149, %19 : vector<1x256xf32>
      %c22 = arith.constant 22 : index
      %151 = memref.load %arg2[%c22] : memref<98xf32, #tpu.memory_space<smem>>
      %152 = vector.broadcast %151 : f32 to vector<1x256xf32>
      %153 = arith.mulf %152, %26 : vector<1x256xf32>
      %154 = arith.addf %150, %153 : vector<1x256xf32>
      %c23 = arith.constant 23 : index
      %155 = memref.load %arg2[%c23] : memref<98xf32, #tpu.memory_space<smem>>
      %156 = vector.broadcast %155 : f32 to vector<1x256xf32>
      %157 = arith.mulf %156, %33 : vector<1x256xf32>
      %158 = arith.addf %154, %157 : vector<1x256xf32>
      %c24 = arith.constant 24 : index
      %159 = memref.load %arg2[%c24] : memref<98xf32, #tpu.memory_space<smem>>
      %160 = vector.broadcast %159 : f32 to vector<1x256xf32>
      %161 = arith.mulf %160, %9 : vector<1x256xf32>
      %162 = arith.addf %158, %161 : vector<1x256xf32>
      %c25 = arith.constant 25 : index
      %163 = memref.load %arg2[%c25] : memref<98xf32, #tpu.memory_space<smem>>
      %164 = vector.broadcast %163 : f32 to vector<1x256xf32>
      %165 = arith.mulf %164, %40 : vector<1x256xf32>
      %166 = arith.addf %162, %165 : vector<1x256xf32>
      %c26 = arith.constant 26 : index
      %167 = memref.load %arg2[%c26] : memref<98xf32, #tpu.memory_space<smem>>
      %168 = vector.broadcast %167 : f32 to vector<1x256xf32>
      %169 = arith.mulf %168, %47 : vector<1x256xf32>
      %170 = arith.addf %166, %169 : vector<1x256xf32>
      %c27 = arith.constant 27 : index
      %171 = memref.load %arg2[%c27] : memref<98xf32, #tpu.memory_space<smem>>
      %172 = vector.broadcast %171 : f32 to vector<1x256xf32>
      %173 = arith.mulf %172, %54 : vector<1x256xf32>
      %174 = arith.addf %170, %173 : vector<1x256xf32>
      %175 = arith.addf %147, %174 : vector<1x256xf32>
      %c28 = arith.constant 28 : index
      %176 = memref.load %arg2[%c28] : memref<98xf32, #tpu.memory_space<smem>>
      %177 = vector.broadcast %176 : f32 to vector<1x256xf32>
      %178 = arith.mulf %177, %19 : vector<1x256xf32>
      %c29 = arith.constant 29 : index
      %179 = memref.load %arg2[%c29] : memref<98xf32, #tpu.memory_space<smem>>
      %180 = vector.broadcast %179 : f32 to vector<1x256xf32>
      %181 = arith.mulf %180, %26 : vector<1x256xf32>
      %182 = arith.addf %178, %181 : vector<1x256xf32>
      %c30 = arith.constant 30 : index
      %183 = memref.load %arg2[%c30] : memref<98xf32, #tpu.memory_space<smem>>
      %184 = vector.broadcast %183 : f32 to vector<1x256xf32>
      %185 = arith.mulf %184, %33 : vector<1x256xf32>
      %186 = arith.addf %182, %185 : vector<1x256xf32>
      %c31 = arith.constant 31 : index
      %187 = memref.load %arg2[%c31] : memref<98xf32, #tpu.memory_space<smem>>
      %188 = vector.broadcast %187 : f32 to vector<1x256xf32>
      %189 = arith.mulf %188, %9 : vector<1x256xf32>
      %190 = arith.addf %186, %189 : vector<1x256xf32>
      %c32 = arith.constant 32 : index
      %191 = memref.load %arg2[%c32] : memref<98xf32, #tpu.memory_space<smem>>
      %192 = vector.broadcast %191 : f32 to vector<1x256xf32>
      %193 = arith.mulf %192, %40 : vector<1x256xf32>
      %194 = arith.addf %190, %193 : vector<1x256xf32>
      %c33 = arith.constant 33 : index
      %195 = memref.load %arg2[%c33] : memref<98xf32, #tpu.memory_space<smem>>
      %196 = vector.broadcast %195 : f32 to vector<1x256xf32>
      %197 = arith.mulf %196, %47 : vector<1x256xf32>
      %198 = arith.addf %194, %197 : vector<1x256xf32>
      %c34 = arith.constant 34 : index
      %199 = memref.load %arg2[%c34] : memref<98xf32, #tpu.memory_space<smem>>
      %200 = vector.broadcast %199 : f32 to vector<1x256xf32>
      %201 = arith.mulf %200, %54 : vector<1x256xf32>
      %202 = arith.addf %198, %201 : vector<1x256xf32>
      %cst_29 = arith.constant 0.000000e+00 : f32
      %203 = vector.broadcast %cst_29 : f32 to vector<1x16xf32>
      %204 = vector.extract_strided_slice %202 {offsets = [0, 16], sizes = [1, 240], strides = [1, 1]} : vector<1x256xf32> to vector<1x240xf32>
      %205 = tpu.concatenate %204, %203 in 1 : vector<1x240xf32>, vector<1x16xf32> -> vector<1x256xf32>
      %206 = arith.addf %175, %205 : vector<1x256xf32>
      %c35 = arith.constant 35 : index
      %207 = memref.load %arg2[%c35] : memref<98xf32, #tpu.memory_space<smem>>
      %208 = vector.broadcast %207 : f32 to vector<1x256xf32>
      %209 = arith.mulf %208, %19 : vector<1x256xf32>
      %c36 = arith.constant 36 : index
      %210 = memref.load %arg2[%c36] : memref<98xf32, #tpu.memory_space<smem>>
      %211 = vector.broadcast %210 : f32 to vector<1x256xf32>
      %212 = arith.mulf %211, %26 : vector<1x256xf32>
      %213 = arith.addf %209, %212 : vector<1x256xf32>
      %c37 = arith.constant 37 : index
      %214 = memref.load %arg2[%c37] : memref<98xf32, #tpu.memory_space<smem>>
      %215 = vector.broadcast %214 : f32 to vector<1x256xf32>
      %216 = arith.mulf %215, %33 : vector<1x256xf32>
      %217 = arith.addf %213, %216 : vector<1x256xf32>
      %c38 = arith.constant 38 : index
      %218 = memref.load %arg2[%c38] : memref<98xf32, #tpu.memory_space<smem>>
      %219 = vector.broadcast %218 : f32 to vector<1x256xf32>
      %220 = arith.mulf %219, %9 : vector<1x256xf32>
      %221 = arith.addf %217, %220 : vector<1x256xf32>
      %c39 = arith.constant 39 : index
      %222 = memref.load %arg2[%c39] : memref<98xf32, #tpu.memory_space<smem>>
      %223 = vector.broadcast %222 : f32 to vector<1x256xf32>
      %224 = arith.mulf %223, %40 : vector<1x256xf32>
      %225 = arith.addf %221, %224 : vector<1x256xf32>
      %c40 = arith.constant 40 : index
      %226 = memref.load %arg2[%c40] : memref<98xf32, #tpu.memory_space<smem>>
      %227 = vector.broadcast %226 : f32 to vector<1x256xf32>
      %228 = arith.mulf %227, %47 : vector<1x256xf32>
      %229 = arith.addf %225, %228 : vector<1x256xf32>
      %c41 = arith.constant 41 : index
      %230 = memref.load %arg2[%c41] : memref<98xf32, #tpu.memory_space<smem>>
      %231 = vector.broadcast %230 : f32 to vector<1x256xf32>
      %232 = arith.mulf %231, %54 : vector<1x256xf32>
      %233 = arith.addf %229, %232 : vector<1x256xf32>
      %cst_30 = arith.constant 0.000000e+00 : f32
      %234 = vector.broadcast %cst_30 : f32 to vector<1x32xf32>
      %235 = vector.extract_strided_slice %233 {offsets = [0, 32], sizes = [1, 224], strides = [1, 1]} : vector<1x256xf32> to vector<1x224xf32>
      %236 = tpu.concatenate %235, %234 in 1 : vector<1x224xf32>, vector<1x32xf32> -> vector<1x256xf32>
      %237 = arith.addf %206, %236 : vector<1x256xf32>
      %c42 = arith.constant 42 : index
      %238 = memref.load %arg2[%c42] : memref<98xf32, #tpu.memory_space<smem>>
      %239 = vector.broadcast %238 : f32 to vector<1x256xf32>
      %240 = arith.mulf %239, %19 : vector<1x256xf32>
      %c43 = arith.constant 43 : index
      %241 = memref.load %arg2[%c43] : memref<98xf32, #tpu.memory_space<smem>>
      %242 = vector.broadcast %241 : f32 to vector<1x256xf32>
      %243 = arith.mulf %242, %26 : vector<1x256xf32>
      %244 = arith.addf %240, %243 : vector<1x256xf32>
      %c44 = arith.constant 44 : index
      %245 = memref.load %arg2[%c44] : memref<98xf32, #tpu.memory_space<smem>>
      %246 = vector.broadcast %245 : f32 to vector<1x256xf32>
      %247 = arith.mulf %246, %33 : vector<1x256xf32>
      %248 = arith.addf %244, %247 : vector<1x256xf32>
      %c45 = arith.constant 45 : index
      %249 = memref.load %arg2[%c45] : memref<98xf32, #tpu.memory_space<smem>>
      %250 = vector.broadcast %249 : f32 to vector<1x256xf32>
      %251 = arith.mulf %250, %9 : vector<1x256xf32>
      %252 = arith.addf %248, %251 : vector<1x256xf32>
      %c46 = arith.constant 46 : index
      %253 = memref.load %arg2[%c46] : memref<98xf32, #tpu.memory_space<smem>>
      %254 = vector.broadcast %253 : f32 to vector<1x256xf32>
      %255 = arith.mulf %254, %40 : vector<1x256xf32>
      %256 = arith.addf %252, %255 : vector<1x256xf32>
      %c47 = arith.constant 47 : index
      %257 = memref.load %arg2[%c47] : memref<98xf32, #tpu.memory_space<smem>>
      %258 = vector.broadcast %257 : f32 to vector<1x256xf32>
      %259 = arith.mulf %258, %47 : vector<1x256xf32>
      %260 = arith.addf %256, %259 : vector<1x256xf32>
      %c48 = arith.constant 48 : index
      %261 = memref.load %arg2[%c48] : memref<98xf32, #tpu.memory_space<smem>>
      %262 = vector.broadcast %261 : f32 to vector<1x256xf32>
      %263 = arith.mulf %262, %54 : vector<1x256xf32>
      %264 = arith.addf %260, %263 : vector<1x256xf32>
      %cst_31 = arith.constant 0.000000e+00 : f32
      %265 = vector.broadcast %cst_31 : f32 to vector<1x48xf32>
      %266 = vector.extract_strided_slice %264 {offsets = [0, 48], sizes = [1, 208], strides = [1, 1]} : vector<1x256xf32> to vector<1x208xf32>
      %267 = tpu.concatenate %266, %265 in 1 : vector<1x208xf32>, vector<1x48xf32> -> vector<1x256xf32>
      %268 = arith.addf %237, %267 : vector<1x256xf32>
      %cst_32 = arith.constant 0.000000e+00 : f32
      %269 = vector.broadcast %cst_32 : f32 to vector<1x3xf32>
      %270 = vector.extract_strided_slice %11 {offsets = [0, 0], sizes = [1, 253], strides = [1, 1]} : vector<1x256xf32> to vector<1x253xf32>
      %271 = tpu.concatenate %269, %270 in 1 : vector<1x3xf32>, vector<1x253xf32> -> vector<1x256xf32>
      %c0_33 = arith.constant 0 : index
      %c0_34 = arith.constant 0 : index
      %272 = vector.load %arg3[%c0_33, %c0_34] : memref<7x256xf32, #tpu.memory_space<vmem>>, vector<1x256xf32>
      %273 = vector.shape_cast %272 : vector<1x256xf32> to vector<256xf32>
      %274 = vector.shape_cast %273 : vector<256xf32> to vector<1x256xf32>
      %275 = arith.mulf %271, %274 : vector<1x256xf32>
      %cst_35 = arith.constant 0.000000e+00 : f32
      %276 = vector.broadcast %cst_35 : f32 to vector<1x2xf32>
      %277 = vector.extract_strided_slice %11 {offsets = [0, 0], sizes = [1, 254], strides = [1, 1]} : vector<1x256xf32> to vector<1x254xf32>
      %278 = tpu.concatenate %276, %277 in 1 : vector<1x2xf32>, vector<1x254xf32> -> vector<1x256xf32>
      %c1_36 = arith.constant 1 : index
      %c0_37 = arith.constant 0 : index
      %279 = vector.load %arg3[%c1_36, %c0_37] : memref<7x256xf32, #tpu.memory_space<vmem>>, vector<1x256xf32>
      %280 = vector.shape_cast %279 : vector<1x256xf32> to vector<256xf32>
      %281 = vector.shape_cast %280 : vector<256xf32> to vector<1x256xf32>
      %282 = arith.mulf %278, %281 : vector<1x256xf32>
      %cst_38 = arith.constant 0.000000e+00 : f32
      %283 = vector.broadcast %cst_38 : f32 to vector<1x1xf32>
      %284 = vector.extract_strided_slice %11 {offsets = [0, 0], sizes = [1, 255], strides = [1, 1]} : vector<1x256xf32> to vector<1x255xf32>
      %285 = tpu.concatenate %283, %284 in 1 : vector<1x1xf32>, vector<1x255xf32> -> vector<1x256xf32>
      %c2_39 = arith.constant 2 : index
      %c0_40 = arith.constant 0 : index
      %286 = vector.load %arg3[%c2_39, %c0_40] : memref<7x256xf32, #tpu.memory_space<vmem>>, vector<1x256xf32>
      %287 = vector.shape_cast %286 : vector<1x256xf32> to vector<256xf32>
      %288 = vector.shape_cast %287 : vector<256xf32> to vector<1x256xf32>
      %289 = arith.mulf %285, %288 : vector<1x256xf32>
      %cst_41 = arith.constant 0.000000e+00 : f32
      %290 = vector.broadcast %cst_41 : f32 to vector<1x1xf32>
      %291 = vector.extract_strided_slice %11 {offsets = [0, 1], sizes = [1, 255], strides = [1, 1]} : vector<1x256xf32> to vector<1x255xf32>
      %292 = tpu.concatenate %291, %290 in 1 : vector<1x255xf32>, vector<1x1xf32> -> vector<1x256xf32>
      %c4_42 = arith.constant 4 : index
      %c0_43 = arith.constant 0 : index
      %293 = vector.load %arg3[%c4_42, %c0_43] : memref<7x256xf32, #tpu.memory_space<vmem>>, vector<1x256xf32>
      %294 = vector.shape_cast %293 : vector<1x256xf32> to vector<256xf32>
      %295 = vector.shape_cast %294 : vector<256xf32> to vector<1x256xf32>
      %296 = arith.mulf %292, %295 : vector<1x256xf32>
      %cst_44 = arith.constant 0.000000e+00 : f32
      %297 = vector.broadcast %cst_44 : f32 to vector<1x2xf32>
      %298 = vector.extract_strided_slice %11 {offsets = [0, 2], sizes = [1, 254], strides = [1, 1]} : vector<1x256xf32> to vector<1x254xf32>
      %299 = tpu.concatenate %298, %297 in 1 : vector<1x254xf32>, vector<1x2xf32> -> vector<1x256xf32>
      %c5_45 = arith.constant 5 : index
      %c0_46 = arith.constant 0 : index
      %300 = vector.load %arg3[%c5_45, %c0_46] : memref<7x256xf32, #tpu.memory_space<vmem>>, vector<1x256xf32>
      %301 = vector.shape_cast %300 : vector<1x256xf32> to vector<256xf32>
      %302 = vector.shape_cast %301 : vector<256xf32> to vector<1x256xf32>
      %303 = arith.mulf %299, %302 : vector<1x256xf32>
      %cst_47 = arith.constant 0.000000e+00 : f32
      %304 = vector.broadcast %cst_47 : f32 to vector<1x3xf32>
      %305 = vector.extract_strided_slice %11 {offsets = [0, 3], sizes = [1, 253], strides = [1, 1]} : vector<1x256xf32> to vector<1x253xf32>
      %306 = tpu.concatenate %305, %304 in 1 : vector<1x253xf32>, vector<1x3xf32> -> vector<1x256xf32>
      %c6_48 = arith.constant 6 : index
      %c0_49 = arith.constant 0 : index
      %307 = vector.load %arg3[%c6_48, %c0_49] : memref<7x256xf32, #tpu.memory_space<vmem>>, vector<1x256xf32>
      %308 = vector.shape_cast %307 : vector<1x256xf32> to vector<256xf32>
      %309 = vector.shape_cast %308 : vector<256xf32> to vector<1x256xf32>
      %310 = arith.mulf %306, %309 : vector<1x256xf32>
      %c49 = arith.constant 49 : index
      %311 = memref.load %arg2[%c49] : memref<98xf32, #tpu.memory_space<smem>>
      %312 = vector.broadcast %311 : f32 to vector<1x256xf32>
      %313 = arith.mulf %312, %275 : vector<1x256xf32>
      %c50 = arith.constant 50 : index
      %314 = memref.load %arg2[%c50] : memref<98xf32, #tpu.memory_space<smem>>
      %315 = vector.broadcast %314 : f32 to vector<1x256xf32>
      %316 = arith.mulf %315, %282 : vector<1x256xf32>
      %317 = arith.addf %313, %316 : vector<1x256xf32>
      %c51 = arith.constant 51 : index
      %318 = memref.load %arg2[%c51] : memref<98xf32, #tpu.memory_space<smem>>
      %319 = vector.broadcast %318 : f32 to vector<1x256xf32>
      %320 = arith.mulf %319, %289 : vector<1x256xf32>
      %321 = arith.addf %317, %320 : vector<1x256xf32>
      %c52 = arith.constant 52 : index
      %322 = memref.load %arg2[%c52] : memref<98xf32, #tpu.memory_space<smem>>
      %323 = vector.broadcast %322 : f32 to vector<1x256xf32>
      %324 = arith.mulf %323, %11 : vector<1x256xf32>
      %325 = arith.addf %321, %324 : vector<1x256xf32>
      %c53 = arith.constant 53 : index
      %326 = memref.load %arg2[%c53] : memref<98xf32, #tpu.memory_space<smem>>
      %327 = vector.broadcast %326 : f32 to vector<1x256xf32>
      %328 = arith.mulf %327, %296 : vector<1x256xf32>
      %329 = arith.addf %325, %328 : vector<1x256xf32>
      %c54 = arith.constant 54 : index
      %330 = memref.load %arg2[%c54] : memref<98xf32, #tpu.memory_space<smem>>
      %331 = vector.broadcast %330 : f32 to vector<1x256xf32>
      %332 = arith.mulf %331, %303 : vector<1x256xf32>
      %333 = arith.addf %329, %332 : vector<1x256xf32>
      %c55 = arith.constant 55 : index
      %334 = memref.load %arg2[%c55] : memref<98xf32, #tpu.memory_space<smem>>
      %335 = vector.broadcast %334 : f32 to vector<1x256xf32>
      %336 = arith.mulf %335, %310 : vector<1x256xf32>
      %337 = arith.addf %333, %336 : vector<1x256xf32>
      %cst_50 = arith.constant 0.000000e+00 : f32
      %338 = vector.broadcast %cst_50 : f32 to vector<1x48xf32>
      %339 = vector.extract_strided_slice %337 {offsets = [0, 0], sizes = [1, 208], strides = [1, 1]} : vector<1x256xf32> to vector<1x208xf32>
      %340 = tpu.concatenate %338, %339 in 1 : vector<1x48xf32>, vector<1x208xf32> -> vector<1x256xf32>
      %341 = arith.addf %268, %340 : vector<1x256xf32>
      %c56 = arith.constant 56 : index
      %342 = memref.load %arg2[%c56] : memref<98xf32, #tpu.memory_space<smem>>
      %343 = vector.broadcast %342 : f32 to vector<1x256xf32>
      %344 = arith.mulf %343, %275 : vector<1x256xf32>
      %c57 = arith.constant 57 : index
      %345 = memref.load %arg2[%c57] : memref<98xf32, #tpu.memory_space<smem>>
      %346 = vector.broadcast %345 : f32 to vector<1x256xf32>
      %347 = arith.mulf %346, %282 : vector<1x256xf32>
      %348 = arith.addf %344, %347 : vector<1x256xf32>
      %c58 = arith.constant 58 : index
      %349 = memref.load %arg2[%c58] : memref<98xf32, #tpu.memory_space<smem>>
      %350 = vector.broadcast %349 : f32 to vector<1x256xf32>
      %351 = arith.mulf %350, %289 : vector<1x256xf32>
      %352 = arith.addf %348, %351 : vector<1x256xf32>
      %c59 = arith.constant 59 : index
      %353 = memref.load %arg2[%c59] : memref<98xf32, #tpu.memory_space<smem>>
      %354 = vector.broadcast %353 : f32 to vector<1x256xf32>
      %355 = arith.mulf %354, %11 : vector<1x256xf32>
      %356 = arith.addf %352, %355 : vector<1x256xf32>
      %c60 = arith.constant 60 : index
      %357 = memref.load %arg2[%c60] : memref<98xf32, #tpu.memory_space<smem>>
      %358 = vector.broadcast %357 : f32 to vector<1x256xf32>
      %359 = arith.mulf %358, %296 : vector<1x256xf32>
      %360 = arith.addf %356, %359 : vector<1x256xf32>
      %c61 = arith.constant 61 : index
      %361 = memref.load %arg2[%c61] : memref<98xf32, #tpu.memory_space<smem>>
      %362 = vector.broadcast %361 : f32 to vector<1x256xf32>
      %363 = arith.mulf %362, %303 : vector<1x256xf32>
      %364 = arith.addf %360, %363 : vector<1x256xf32>
      %c62 = arith.constant 62 : index
      %365 = memref.load %arg2[%c62] : memref<98xf32, #tpu.memory_space<smem>>
      %366 = vector.broadcast %365 : f32 to vector<1x256xf32>
      %367 = arith.mulf %366, %310 : vector<1x256xf32>
      %368 = arith.addf %364, %367 : vector<1x256xf32>
      %cst_51 = arith.constant 0.000000e+00 : f32
      %369 = vector.broadcast %cst_51 : f32 to vector<1x32xf32>
      %370 = vector.extract_strided_slice %368 {offsets = [0, 0], sizes = [1, 224], strides = [1, 1]} : vector<1x256xf32> to vector<1x224xf32>
      %371 = tpu.concatenate %369, %370 in 1 : vector<1x32xf32>, vector<1x224xf32> -> vector<1x256xf32>
      %372 = arith.addf %341, %371 : vector<1x256xf32>
      %c63 = arith.constant 63 : index
      %373 = memref.load %arg2[%c63] : memref<98xf32, #tpu.memory_space<smem>>
      %374 = vector.broadcast %373 : f32 to vector<1x256xf32>
      %375 = arith.mulf %374, %275 : vector<1x256xf32>
      %c64 = arith.constant 64 : index
      %376 = memref.load %arg2[%c64] : memref<98xf32, #tpu.memory_space<smem>>
      %377 = vector.broadcast %376 : f32 to vector<1x256xf32>
      %378 = arith.mulf %377, %282 : vector<1x256xf32>
      %379 = arith.addf %375, %378 : vector<1x256xf32>
      %c65 = arith.constant 65 : index
      %380 = memref.load %arg2[%c65] : memref<98xf32, #tpu.memory_space<smem>>
      %381 = vector.broadcast %380 : f32 to vector<1x256xf32>
      %382 = arith.mulf %381, %289 : vector<1x256xf32>
      %383 = arith.addf %379, %382 : vector<1x256xf32>
      %c66 = arith.constant 66 : index
      %384 = memref.load %arg2[%c66] : memref<98xf32, #tpu.memory_space<smem>>
      %385 = vector.broadcast %384 : f32 to vector<1x256xf32>
      %386 = arith.mulf %385, %11 : vector<1x256xf32>
      %387 = arith.addf %383, %386 : vector<1x256xf32>
      %c67 = arith.constant 67 : index
      %388 = memref.load %arg2[%c67] : memref<98xf32, #tpu.memory_space<smem>>
      %389 = vector.broadcast %388 : f32 to vector<1x256xf32>
      %390 = arith.mulf %389, %296 : vector<1x256xf32>
      %391 = arith.addf %387, %390 : vector<1x256xf32>
      %c68 = arith.constant 68 : index
      %392 = memref.load %arg2[%c68] : memref<98xf32, #tpu.memory_space<smem>>
      %393 = vector.broadcast %392 : f32 to vector<1x256xf32>
      %394 = arith.mulf %393, %303 : vector<1x256xf32>
      %395 = arith.addf %391, %394 : vector<1x256xf32>
      %c69 = arith.constant 69 : index
      %396 = memref.load %arg2[%c69] : memref<98xf32, #tpu.memory_space<smem>>
      %397 = vector.broadcast %396 : f32 to vector<1x256xf32>
      %398 = arith.mulf %397, %310 : vector<1x256xf32>
      %399 = arith.addf %395, %398 : vector<1x256xf32>
      %cst_52 = arith.constant 0.000000e+00 : f32
      %400 = vector.broadcast %cst_52 : f32 to vector<1x16xf32>
      %401 = vector.extract_strided_slice %399 {offsets = [0, 0], sizes = [1, 240], strides = [1, 1]} : vector<1x256xf32> to vector<1x240xf32>
      %402 = tpu.concatenate %400, %401 in 1 : vector<1x16xf32>, vector<1x240xf32> -> vector<1x256xf32>
      %403 = arith.addf %372, %402 : vector<1x256xf32>
      %c70 = arith.constant 70 : index
      %404 = memref.load %arg2[%c70] : memref<98xf32, #tpu.memory_space<smem>>
      %405 = vector.broadcast %404 : f32 to vector<1x256xf32>
      %406 = arith.mulf %405, %275 : vector<1x256xf32>
      %c71 = arith.constant 71 : index
      %407 = memref.load %arg2[%c71] : memref<98xf32, #tpu.memory_space<smem>>
      %408 = vector.broadcast %407 : f32 to vector<1x256xf32>
      %409 = arith.mulf %408, %282 : vector<1x256xf32>
      %410 = arith.addf %406, %409 : vector<1x256xf32>
      %c72 = arith.constant 72 : index
      %411 = memref.load %arg2[%c72] : memref<98xf32, #tpu.memory_space<smem>>
      %412 = vector.broadcast %411 : f32 to vector<1x256xf32>
      %413 = arith.mulf %412, %289 : vector<1x256xf32>
      %414 = arith.addf %410, %413 : vector<1x256xf32>
      %c73 = arith.constant 73 : index
      %415 = memref.load %arg2[%c73] : memref<98xf32, #tpu.memory_space<smem>>
      %416 = vector.broadcast %415 : f32 to vector<1x256xf32>
      %417 = arith.mulf %416, %11 : vector<1x256xf32>
      %418 = arith.addf %414, %417 : vector<1x256xf32>
      %c74 = arith.constant 74 : index
      %419 = memref.load %arg2[%c74] : memref<98xf32, #tpu.memory_space<smem>>
      %420 = vector.broadcast %419 : f32 to vector<1x256xf32>
      %421 = arith.mulf %420, %296 : vector<1x256xf32>
      %422 = arith.addf %418, %421 : vector<1x256xf32>
      %c75 = arith.constant 75 : index
      %423 = memref.load %arg2[%c75] : memref<98xf32, #tpu.memory_space<smem>>
      %424 = vector.broadcast %423 : f32 to vector<1x256xf32>
      %425 = arith.mulf %424, %303 : vector<1x256xf32>
      %426 = arith.addf %422, %425 : vector<1x256xf32>
      %c76 = arith.constant 76 : index
      %427 = memref.load %arg2[%c76] : memref<98xf32, #tpu.memory_space<smem>>
      %428 = vector.broadcast %427 : f32 to vector<1x256xf32>
      %429 = arith.mulf %428, %310 : vector<1x256xf32>
      %430 = arith.addf %426, %429 : vector<1x256xf32>
      %431 = arith.addf %403, %430 : vector<1x256xf32>
      %c77 = arith.constant 77 : index
      %432 = memref.load %arg2[%c77] : memref<98xf32, #tpu.memory_space<smem>>
      %433 = vector.broadcast %432 : f32 to vector<1x256xf32>
      %434 = arith.mulf %433, %275 : vector<1x256xf32>
      %c78 = arith.constant 78 : index
      %435 = memref.load %arg2[%c78] : memref<98xf32, #tpu.memory_space<smem>>
      %436 = vector.broadcast %435 : f32 to vector<1x256xf32>
      %437 = arith.mulf %436, %282 : vector<1x256xf32>
      %438 = arith.addf %434, %437 : vector<1x256xf32>
      %c79 = arith.constant 79 : index
      %439 = memref.load %arg2[%c79] : memref<98xf32, #tpu.memory_space<smem>>
      %440 = vector.broadcast %439 : f32 to vector<1x256xf32>
      %441 = arith.mulf %440, %289 : vector<1x256xf32>
      %442 = arith.addf %438, %441 : vector<1x256xf32>
      %c80 = arith.constant 80 : index
      %443 = memref.load %arg2[%c80] : memref<98xf32, #tpu.memory_space<smem>>
      %444 = vector.broadcast %443 : f32 to vector<1x256xf32>
      %445 = arith.mulf %444, %11 : vector<1x256xf32>
      %446 = arith.addf %442, %445 : vector<1x256xf32>
      %c81 = arith.constant 81 : index
      %447 = memref.load %arg2[%c81] : memref<98xf32, #tpu.memory_space<smem>>
      %448 = vector.broadcast %447 : f32 to vector<1x256xf32>
      %449 = arith.mulf %448, %296 : vector<1x256xf32>
      %450 = arith.addf %446, %449 : vector<1x256xf32>
      %c82 = arith.constant 82 : index
      %451 = memref.load %arg2[%c82] : memref<98xf32, #tpu.memory_space<smem>>
      %452 = vector.broadcast %451 : f32 to vector<1x256xf32>
      %453 = arith.mulf %452, %303 : vector<1x256xf32>
      %454 = arith.addf %450, %453 : vector<1x256xf32>
      %c83 = arith.constant 83 : index
      %455 = memref.load %arg2[%c83] : memref<98xf32, #tpu.memory_space<smem>>
      %456 = vector.broadcast %455 : f32 to vector<1x256xf32>
      %457 = arith.mulf %456, %310 : vector<1x256xf32>
      %458 = arith.addf %454, %457 : vector<1x256xf32>
      %cst_53 = arith.constant 0.000000e+00 : f32
      %459 = vector.broadcast %cst_53 : f32 to vector<1x16xf32>
      %460 = vector.extract_strided_slice %458 {offsets = [0, 16], sizes = [1, 240], strides = [1, 1]} : vector<1x256xf32> to vector<1x240xf32>
      %461 = tpu.concatenate %460, %459 in 1 : vector<1x240xf32>, vector<1x16xf32> -> vector<1x256xf32>
      %462 = arith.addf %431, %461 : vector<1x256xf32>
      %c84 = arith.constant 84 : index
      %463 = memref.load %arg2[%c84] : memref<98xf32, #tpu.memory_space<smem>>
      %464 = vector.broadcast %463 : f32 to vector<1x256xf32>
      %465 = arith.mulf %464, %275 : vector<1x256xf32>
      %c85 = arith.constant 85 : index
      %466 = memref.load %arg2[%c85] : memref<98xf32, #tpu.memory_space<smem>>
      %467 = vector.broadcast %466 : f32 to vector<1x256xf32>
      %468 = arith.mulf %467, %282 : vector<1x256xf32>
      %469 = arith.addf %465, %468 : vector<1x256xf32>
      %c86 = arith.constant 86 : index
      %470 = memref.load %arg2[%c86] : memref<98xf32, #tpu.memory_space<smem>>
      %471 = vector.broadcast %470 : f32 to vector<1x256xf32>
      %472 = arith.mulf %471, %289 : vector<1x256xf32>
      %473 = arith.addf %469, %472 : vector<1x256xf32>
      %c87 = arith.constant 87 : index
      %474 = memref.load %arg2[%c87] : memref<98xf32, #tpu.memory_space<smem>>
      %475 = vector.broadcast %474 : f32 to vector<1x256xf32>
      %476 = arith.mulf %475, %11 : vector<1x256xf32>
      %477 = arith.addf %473, %476 : vector<1x256xf32>
      %c88 = arith.constant 88 : index
      %478 = memref.load %arg2[%c88] : memref<98xf32, #tpu.memory_space<smem>>
      %479 = vector.broadcast %478 : f32 to vector<1x256xf32>
      %480 = arith.mulf %479, %296 : vector<1x256xf32>
      %481 = arith.addf %477, %480 : vector<1x256xf32>
      %c89 = arith.constant 89 : index
      %482 = memref.load %arg2[%c89] : memref<98xf32, #tpu.memory_space<smem>>
      %483 = vector.broadcast %482 : f32 to vector<1x256xf32>
      %484 = arith.mulf %483, %303 : vector<1x256xf32>
      %485 = arith.addf %481, %484 : vector<1x256xf32>
      %c90 = arith.constant 90 : index
      %486 = memref.load %arg2[%c90] : memref<98xf32, #tpu.memory_space<smem>>
      %487 = vector.broadcast %486 : f32 to vector<1x256xf32>
      %488 = arith.mulf %487, %310 : vector<1x256xf32>
      %489 = arith.addf %485, %488 : vector<1x256xf32>
      %cst_54 = arith.constant 0.000000e+00 : f32
      %490 = vector.broadcast %cst_54 : f32 to vector<1x32xf32>
      %491 = vector.extract_strided_slice %489 {offsets = [0, 32], sizes = [1, 224], strides = [1, 1]} : vector<1x256xf32> to vector<1x224xf32>
      %492 = tpu.concatenate %491, %490 in 1 : vector<1x224xf32>, vector<1x32xf32> -> vector<1x256xf32>
      %493 = arith.addf %462, %492 : vector<1x256xf32>
      %c91 = arith.constant 91 : index
      %494 = memref.load %arg2[%c91] : memref<98xf32, #tpu.memory_space<smem>>
      %495 = vector.broadcast %494 : f32 to vector<1x256xf32>
      %496 = arith.mulf %495, %275 : vector<1x256xf32>
      %c92 = arith.constant 92 : index
      %497 = memref.load %arg2[%c92] : memref<98xf32, #tpu.memory_space<smem>>
      %498 = vector.broadcast %497 : f32 to vector<1x256xf32>
      %499 = arith.mulf %498, %282 : vector<1x256xf32>
      %500 = arith.addf %496, %499 : vector<1x256xf32>
      %c93 = arith.constant 93 : index
      %501 = memref.load %arg2[%c93] : memref<98xf32, #tpu.memory_space<smem>>
      %502 = vector.broadcast %501 : f32 to vector<1x256xf32>
      %503 = arith.mulf %502, %289 : vector<1x256xf32>
      %504 = arith.addf %500, %503 : vector<1x256xf32>
      %c94 = arith.constant 94 : index
      %505 = memref.load %arg2[%c94] : memref<98xf32, #tpu.memory_space<smem>>
      %506 = vector.broadcast %505 : f32 to vector<1x256xf32>
      %507 = arith.mulf %506, %11 : vector<1x256xf32>
      %508 = arith.addf %504, %507 : vector<1x256xf32>
      %c95 = arith.constant 95 : index
      %509 = memref.load %arg2[%c95] : memref<98xf32, #tpu.memory_space<smem>>
      %510 = vector.broadcast %509 : f32 to vector<1x256xf32>
      %511 = arith.mulf %510, %296 : vector<1x256xf32>
      %512 = arith.addf %508, %511 : vector<1x256xf32>
      %c96 = arith.constant 96 : index
      %513 = memref.load %arg2[%c96] : memref<98xf32, #tpu.memory_space<smem>>
      %514 = vector.broadcast %513 : f32 to vector<1x256xf32>
      %515 = arith.mulf %514, %303 : vector<1x256xf32>
      %516 = arith.addf %512, %515 : vector<1x256xf32>
      %c97 = arith.constant 97 : index
      %517 = memref.load %arg2[%c97] : memref<98xf32, #tpu.memory_space<smem>>
      %518 = vector.broadcast %517 : f32 to vector<1x256xf32>
      %519 = arith.mulf %518, %310 : vector<1x256xf32>
      %520 = arith.addf %516, %519 : vector<1x256xf32>
      %cst_55 = arith.constant 0.000000e+00 : f32
      %521 = vector.broadcast %cst_55 : f32 to vector<1x48xf32>
      %522 = vector.extract_strided_slice %520 {offsets = [0, 48], sizes = [1, 208], strides = [1, 1]} : vector<1x256xf32> to vector<1x208xf32>
      %523 = tpu.concatenate %522, %521 in 1 : vector<1x208xf32>, vector<1x48xf32> -> vector<1x256xf32>
      %524 = arith.addf %493, %523 : vector<1x256xf32>
      %525 = arith.negf %524 : vector<1x256xf32>
      %526 = math.exp %525 : vector<1x256xf32>
      %cst_56 = arith.constant 1.000000e+00 : f32
      %527 = vector.broadcast %cst_56 : f32 to vector<1x256xf32>
      %528 = arith.addf %527, %526 : vector<1x256xf32>
      %529 = arith.divf %527, %528 : vector<1x256xf32>
      %530 = vector.broadcast %529 : vector<1x256xf32> to vector<4x256xf32>
      %531 = arith.mulf %530, %5 : vector<4x256xf32>
      %532 = arith.index_cast %2 : i32 to index
      %c0_57 = arith.constant 0 : index
      %c0_58 = arith.constant 0 : index
      %533 = vector.load %arg4[%532, %c0_57, %c0_58] : memref<2x4x256xf32, #tpu.memory_space<vmem>>, vector<1x4x256xf32>
      %534 = vector.shape_cast %533 : vector<1x4x256xf32> to vector<4x256xf32>
      %535 = vector.shape_cast %531 : vector<4x256xf32> to vector<1x4x256xf32>
      tpu.vector_store %arg4[%532, %c0_57, %c0_58], %535 {strides = array<i32>} : memref<2x4x256xf32, #tpu.memory_space<vmem>>, vector<1x4x256xf32>,
    }
    %c2_i32_0 = arith.constant 2 : i32
    return
  }
  func.func @transform_0(%arg0: i32) -> (i32, i32, i32) {
    %c0_i32 = arith.constant 0 : i32
    %c0_i32_0 = arith.constant 0 : i32
    %c0_i32_1 = arith.constant 0 : i32
    return %arg0, %c0_i32, %c0_i32_0 : i32, i32, i32
  }
  func.func @transform_1(%arg0: i32) -> i32 {
    %c0_i32 = arith.constant 0 : i32
    %c0_i32_0 = arith.constant 0 : i32
    return %c0_i32 : i32
  }
  func.func @transform_2(%arg0: i32) -> (i32, i32) {
    %c0_i32 = arith.constant 0 : i32
    %c0_i32_0 = arith.constant 0 : i32
    %c0_i32_1 = arith.constant 0 : i32
    return %c0_i32, %c0_i32_0 : i32, i32
  }
  func.func @transform_3(%arg0: i32) -> (i32, i32, i32) {
    %c0_i32 = arith.constant 0 : i32
    %c0_i32_0 = arith.constant 0 : i32
    %c0_i32_1 = arith.constant 0 : i32
    return %arg0, %c0_i32, %c0_i32_0 : i32, i32, i32
  }
}

</mosaic_0001>

<bundles_post_ra>
// kernel: tpu_custom_call.1
= control target key start
LH: loop header
LB: loop body
LE: loop exit
PB: predicated region body
PF: predicated region fallthrough
CT: control target
= control target key end

     0   :  { %s2463_s0 = inlined_call_operand.hbm [shape: f32[2,4,256], index: 0, kind: input, shape index: {}]   ;;  %s2464_s1 = inlined_call_operand.hbm [shape: f32[98], index: 1, kind: input, shape index: {}]   ;;  %s2465_s2 = inlined_call_operand.hbm [shape: f32[7,256], index: 2, kind: input, shape index: {}]   ;;  %s2466_s3 = inlined_call_operand.hbm [shape: f32[2,4,256], index: 3, kind: output, shape index: {}]  }
   0x1   :  { %2501 = sst [smem:[#allocation21_spill]] %s2466_s3 }
   0x2   :  { %8 = vsyncpa [#allocation3], 0 }
   0x3   :  { %9 = vsyncpa [#allocation5], 0 }
   0x4   :  { %10 = vsyncpa [#allocation8], 0 }
   0x5   :  { %11 = vsyncpa [#allocation4], 0  ;;  %s16_s14 = sshll.u32 %s2463_s0, 4  ;;  %s1328_s15 = smov [#allocation2]   ;;  %s17_s14 = int_to_ptr.hbm [resolvable:$true] %s16_s14 }
   0x6   :  { %s18_s16 = sshll.u32 %s1328_s15, 4  ;;  %s30_s19 = sshll.u32 %s2464_s1, 4  ;;  %s19_s16 = int_to_ptr.vmem [resolvable:$true] %s18_s16  ;;  %s31_s19 = int_to_ptr.hbm [resolvable:$true] %s30_s19 }
   0x7   :  { %s2467_s20 = smov 128   ;;  %s2468_s21 = smov 8  }
   0x8   :  { %24 = dma.hbm_to_vmem [thread:$0]  %s17_s14, 256, %s19_s16, [#allocation3], %s2467_s20, %s2467_s20, %s2468_s21  }
   0x9   :  { %s1331_s22 = smov [#allocation6]   ;;  %s39_s0 = sshll.u32 %s2465_s2, 4  ;;  %s40_s0 = int_to_ptr.hbm [resolvable:$true] %s39_s0 }
   0xa   :  { %33 = dma.hbm_to_smem %s31_s19, 16, %s1331_s22, [#allocation5]  }
   0xb   :  { %s1332_s25 = smov [#allocation7]  }
   0xc   :  { %s41_s26 = sshll.u32 %s1332_s25, 4  ;;  %s42_s26 = int_to_ptr.vmem [resolvable:$true] %s41_s26 }
   0xd   :  { %44 = dma.hbm_to_vmem [thread:$0]  %s40_s0, 256, %s42_s26, [#allocation8]  }
   0xe   :  { %1316 = dma.done.wait [#allocation3], 256  }
   0xf   :  { %1317 = vsyncadd [#allocation3], 4294967040 }
  0x10   :  { %1318 = dma.done.wait [#allocation5], 16  }
  0x11   :  { %1319 = vsyncadd [#allocation5], 4294967280 }
  0x12   :  { %1320 = dma.done.wait [#allocation8], 256  }
  0x13   :  { %1321 = vsyncadd [#allocation8], 4294967040 }
  0x14   :  { %57 = sfence }
  0x15   :  { %s1379_s1 = smov 0  }
  0x16 LB: > { %2502 = sst [smem:[#allocation14_spill]] %s1326_s1  ;;  %v1333_v0 = vmov 4.0   ;;  %s2469_s2 = sshll.u32 %s1326_s1, 3  ;;  %vm74_vm0 = vcmask 1043456   ;;  %vm158_vm2 = vcmask 7168   ;;  %vm140_vm3 = vcmask 15360   ;;  %s1326_s1 = sphi %s1379_s1, %s63_s1  }
  0x17   : > { %1218 = vrcp.f32 %v1333_v0  ;;  %s66_s27 = scalar_lea.vmem [#allocation2], %s2469_s2  ;;  %s1334_s28 = smov 2   ;;  %v1483_v43 = vld [vmem:[#allocation7 + $0x2] ss:$8 sm:$0x3]  ;;  %vm123_vm4 = vcmask 23552  }
  0x18   : > { %v67_v1 = vld [vmem:[%s66_s27] sm:$0xff]  ;;  %s1335_s29 = smov 3   ;;  %s1336_s30 = smov 1   ;;  %v2475_v46 = vperm.slane %v1483_v43, 0  ;;  %v2474_v49 = vperm.slane %v1483_v43, 1  ;;  %vm212_vm5 = vcmask 1022976  }
  0x19   : > { %69 = vst [vmem:[#allocation1] ss:$2 sm:$0xff] %v67_v1  ;;  %s1337_s4 = smov 127   ;;  %s1338_s5 = smov 126   ;;  %vm176_vm6 = vcmask 1039360   ;;  %vm194_vm7 = vcmask 1031168  }
  0x1a   : > { %s1339_s6 = smov 125   ;;  %s1435_s7 = sld [smem:[#allocation6]]  ;;  %v1485_v44 = vld [vmem:[#allocation7 + $0x1] ss:$8 sm:$0x3]  ;;  %vm325_vm8 = vcmask 261120  }
  0x1b   : > { %s1437_s8 = sld [smem:[#allocation6 + $0x1]]  ;;  %v1487_v45 = vld [vmem:[#allocation7] ss:$8 sm:$0x3]  ;;  %v2491_v47 = vperm.slane %v1485_v44, 0  ;;  %v2494_v50 = vperm.slane %v1485_v44, 1 }
  0x1c   : > { %s1439_s9 = sld [smem:[#allocation6 + $0x2]]  ;;  %v2481_v48 = vperm.slane %v1487_v45, 0  ;;  %vm272_vm9 = vcmask 392192   ;;  %vm378_vm10 = vcmask 130048   ;;  %vm473_vm11 = vcmask 916480  }
  0x1d   : > { %v1219_v2 = vpop.eup %1218  ;;  %s1441_s10 = sld [smem:[#allocation6 + $0x3]]  ;;  %vm526_vm12 = vcmask 785408   ;;  %vm579_vm13 = vcmask 654336  }
  0x1e   : > { %v90_v3 = vmul.f32 4.0, %v1219_v2  ;;  %vm94_vm1 = vweird.f32 %v1219_v2  ;;  %s1443_s11 = sld [smem:[#allocation6 + $0x7]] }
  0x1f   : > { %s1445_s12 = sld [smem:[#allocation6 + $0x8]] }
  0x20   : > { %v91_v4 = vsub.f32 1.0, %v90_v3  ;;  %v70_v5 = vld.sshfl [vmem:[#allocation1] sm:$0xff pattern:$0x75316420]  ;;  %s1447_s13 = sld [smem:[#allocation6 + $0x9]]  ;;  %v2490_v51 = vstv %s1435_s7 }
  0x21   : > { %v71_v6 = vld.sshfl [vmem:[#allocation1 + $0x8] sm:$0xff pattern:$0x75316420]  ;;  %v75_v7 = vsel %vm74_vm0, %v70_v5, 0.0  ;;  %s1449_s14 = sld [smem:[#allocation6 + $0xa]]  ;;  %v2487_v53 = vstv %s1437_s8 }
  0x22   : > { %v82_v8 = vsel %vm74_vm0, %v71_v6, 0.0  ;;  %98 = vst [vmem:[#allocation1] ss:$2 sm:$0xff] %v67_v1  ;;  %v76_v9 = vrot.slane %v75_v7, 4  ;;  %v92_v11 = vmul.f32 %v1219_v2, %v91_v4  ;;  %s1451_s15 = sld [smem:[#allocation6 + $0xe]]  ;;  %v237_v61 = vstv %s1439_s9 }
  0x23   : > { %v83_v10 = vrot.slane %v82_v8, 4  ;;  %s1453_s16 = sld [smem:[#allocation6 + $0xf]]  ;;  %v243_v58 = vstv %s1441_s10 }
  0x24   : > { %v77_v12 = vadd.f32 %v76_v9, %v75_v7  ;;  %v93_v16 = vadd.f32 %v1219_v2, %v92_v11  ;;  %s1455_s17 = sld [smem:[#allocation6 + $0x10]]  ;;  %v2484_v54 = vstv %s1443_s11 }
  0x25   : > { %v84_v13 = vadd.f32 %v83_v10, %v82_v8  ;;  %s1457_s18 = sld [smem:[#allocation6 + $0x11]]  ;;  %v2483_v55 = vstv %s1445_s12 }
  0x26   : > { %v78_v14 = vrot.slane %v77_v12, 2  ;;  %v95_v22 = vsel %vm94_vm1, %v1219_v2, %v93_v16  ;;  %s1459_s19 = sld [smem:[#allocation6 + $0x1c]]  ;;  %v290_v62 = vstv %s1447_s13  ;;  %v1522_v2 = vld [vmem:[#allocation7 + $0x4] ss:$8 sm:$0x3] }
  0x27   : > { %v85_v15 = vrot.slane %v84_v13, 2  ;;  %s1461_s22 = sld [smem:[#allocation6 + $0x1d]]  ;;  %v296_v59 = vstv %s1449_s14 }
  0x28   : > { %v79_v17 = vadd.f32 %v78_v14, %v77_v12  ;;  %2504 = sst [smem:[#allocation16_spill]] %s1451_s15  ;;  %v2486_v56 = vstv %s1451_s15 }
  0x29   : > { %v86_v18 = vadd.f32 %v85_v15, %v84_v13  ;;  %v100_v19 = vld.sshfl [vmem:[#allocation1 + $0x8] sm:$0xff pattern:$0x75316420]  ;;  %v99_v20 = vld.sshfl [vmem:[#allocation1] sm:$0xff pattern:$0x75316420]  ;;  %v2488_v60 = vstv %s1453_s16 }
  0x2a   : > { %1042 = vst [vmem:[#allocation1] ss:$2 sm:$0xff] %v67_v1  ;;  %v80_v21 = vrot.slane %v79_v17, 1  ;;  %v110_v28 = vsel %vm74_vm0, %v100_v19, -inf  ;;  %v103_v29 = vsel %vm74_vm0, %v99_v20, -inf  ;;  %s1463_s23 = sld [smem:[#allocation6 + $0x4]]  ;;  %v343_v3 = vstv %s1455_s17 }
  0x2b   : > { %v87_v24 = vrot.slane %v86_v18, 1  ;;  %v111_v30 = vrot.slane %v110_v28, 4  ;;  %v104_v31 = vrot.slane %v103_v29, 4  ;;  %s1465_s24 = sld [smem:[#allocation6 + $0xb]]  ;;  %v349_v63 = vstv %s1457_s18 }
  0x2c   : > { %v81_v23 = vadd.f32 %v80_v21, %v79_v17  ;;  %s1467_s0 = sld [smem:[#allocation6 + $0x12]]  ;;  %v428_v0 = vstv %s1459_s19  ;;  %v2495_v1 = vperm.slane %v1487_v45, 1  ;;  %v1562_v19 = vld [vmem:[#allocation7 + $0x6] ss:$8 sm:$0x3] }
  0x2d   : > { %v88_v26 = vadd.f32 %v87_v24, %v86_v18  ;;  %v112_v32 = vmax.f32 %v110_v28, %v111_v30  ;;  %v105_v33 = vmax.f32 %v103_v29, %v104_v31  ;;  %s1469_s25 = sld [smem:[#allocation6 + $0x1e]]  ;;  %v432_v4 = vstv %s1461_s22 }
  0x2e   : > { %v1389_v25 = vmul.f32 %v95_v22, %v81_v23  ;;  %s1471_s26 = sld [smem:[#allocation6 + $0x1f]] }
  0x2f   : > { %v1397_v27 = vmul.f32 %v95_v22, %v88_v26  ;;  %v113_v34 = vrot.slane %v112_v32, 2  ;;  %v106_v35 = vrot.slane %v105_v33, 2  ;;  %s1473_s27 = sld [smem:[#allocation6 + $0x20]] }
  0x30   : > { %136 = vrot.lane.b32.xlu1 %v1389_v25, %s1334_s28  ;;  %119 = vrot.lane.b32.xlu0 %v1389_v25, %s1335_s29  ;;  %s1495_s20 = sld [smem:[#allocation6 + $0x2b]]  ;;  %v1535_v8 = vmul.f32 %v296_v59, %v1389_v25  ;;  %v1538_v9 = vmul.f32 %v243_v58, %v1389_v25  ;;  %v1543_v10 = vmul.f32 %v349_v63, %v1389_v25 }
  0x31   : > { %154 = vrot.lane.b32.xlu2 %v1389_v25, %s1336_s30  ;;  %2503 = vst [vmem:[#allocation15_spill] sm:$0xff] %v1397_v27  ;;  %v114_v36 = vmax.f32 %v112_v32, %v113_v34  ;;  %v107_v37 = vmax.f32 %v105_v33, %v106_v35  ;;  %s1501_s21 = sld [smem:[#allocation6 + $0x2c]]  ;;  %v1587_v31 = vmul.f32 %v243_v58, %v1397_v27  ;;  %v2482_v34 = vperm.slane %v1562_v19, 1 }
  0x32   : > { %s1506_s2 = sld [smem:[#allocation6 + $0xc]]  ;;  %v1590_v32 = vmul.f32 %v349_v63, %v1397_v27 }
  0x33   : > { %v115_v38 = vrot.slane %v114_v36, 1  ;;  %v108_v39 = vrot.slane %v107_v37, 1  ;;  %s1513_s3 = sld [smem:[#allocation6 + $0x2d]]  ;;  %v438_v11 = vstv %s1469_s25 }
  0x34   : > { %s1516_s1 = sld [smem:[#allocation6 + $0x6]]  ;;  %v444_v5 = vstv %s1471_s26 }
  0x35   : > { %v1413_v40 = vmax.f32 %v114_v36, %v115_v38  ;;  %v1415_v41 = vmax.f32 %v107_v37, %v108_v39  ;;  %s1524_s15 = sld [smem:[#allocation6 + $0xd]]  ;;  %v1552_v15 = vmul.f32 %v444_v5, %v1389_v25  ;;  %v1598_v36 = vmul.f32 %v296_v59, %v1397_v27  ;;  %v1602_v37 = vld [vmem:[#allocation7 + $0x5] ss:$8 sm:$0x3] }
  0x36   : > { %s1540_s9 = sld [smem:[#allocation6 + $0x13]] }
  0x37   : > { %s1545_s10 = sld [smem:[#allocation6 + $0x14]]  ;;  %v2478_v22 = vstv %s1501_s21 }
  0x38   : > { %138 = vrot.lane.b32.xlu1 %v1397_v27, %s1334_s28  ;;  %121 = vrot.lane.b32.xlu0 %v1397_v27, %s1335_s29  ;;  %s1555_s13 = sld [smem:[#allocation6 + $0x27]] }
  0x39   : > { %156 = vrot.lane.b32.xlu2 %v1397_v27, %s1336_s30  ;;  %s1567_s14 = sld [smem:[#allocation6 + $0x2e]]  ;;  %v2479_v33 = vstv %s1513_s3 }
  0x3a   : > { %s1583_s17 = sld [smem:[#allocation6 + $0x21]] }
  0x3b   : > { %s1592_s18 = sld [smem:[#allocation6 + $0x22]] }
  0x3c   : > { %s1600_s25 = sld [smem:[#allocation6 + $0x28]] }
  0x3d   : > { %s1641_s26 = sld [smem:[#allocation6 + $0x29]] }
  0x3e   : > { %s1973_s22 = sld [smem:[#allocation6 + $0x38]] }
  0x40   : > { %174 = vrot.lane.b32.xlu1 %v1397_v27, %s1337_s4  ;;  %172 = vrot.lane.b32.xlu0 %v1389_v25, %s1337_s4 }
  0x41   : > { %190 = vrot.lane.b32.xlu2 %v1389_v25, %s1338_s5  ;;  %v2496_v14 = vstv %s1592_s18 }
  0x48   : > { %208 = vrot.lane.b32.xlu1 %v1389_v25, %s1339_s6  ;;  %192 = vrot.lane.b32.xlu0 %v1397_v27, %s1338_s5 }
  0x49   : > { %210 = vrot.lane.b32.xlu2 %v1397_v27, %s1339_s6 }
  0x50   : > { %590 = vrot.lane.b32.xlu1 %v1413_v40, %s1335_s29  ;;  %588 = vrot.lane.b32.xlu0 %v1415_v41, %s1335_s29  ;;  %s1477_s29 = sld [smem:[#allocation6 + $0x24]] }
  0x51   : > { %598 = vrot.lane.b32.xlu2 %v1415_v41, %s1334_s28 }
  0x58   : > { %608 = vrot.lane.b32.xlu1 %v1415_v41, %s1336_s30  ;;  %600 = vrot.lane.b32.xlu0 %v1413_v40, %s1334_s28  ;;  %s1475_s28 = sld [smem:[#allocation6 + $0x23]] }
  0x59   : > { %610 = vrot.lane.b32.xlu2 %v1413_v40, %s1336_s30  ;;  %s1479_s30 = sld [smem:[#allocation6 + $0x5]] }
  0x60   : > { %620 = vrot.lane.b32.xlu1 %v1413_v40, %s1337_s4  ;;  %618 = vrot.lane.b32.xlu0 %v1415_v41, %s1337_s4  ;;  %s1481_s4 = sld [smem:[#allocation6 + $0x25]] }
  0x61   : > { %628 = vrot.lane.b32.xlu2 %v1415_v41, %s1338_s5 }
  0x66   : > { %2505 = sst [smem:[#allocation17_spill]] %s1481_s4  ;;  %v2476_v16 = vstv %s1481_s4 }
  0x67   : > { %s1728_s4 = sld [smem:[#allocation6 + $0x2f]] }
  0x68   : > { %630 = vrot.lane.b32.xlu0 %v1413_v40, %s1338_s5  ;;  %638 = vrot.lane.b32.xlu1 %v1415_v41, %s1339_s6  ;;  %s1489_s5 = sld [smem:[#allocation6 + $0x26]] }
  0x69   : > { %640 = vrot.lane.b32.xlu2 %v1413_v40, %s1339_s6  ;;  %s1491_s6 = sld [smem:[#allocation6 + $0x2a]] }
  0x6a   : > { %s2555_s19 = sld [smem:[#allocation17_spill]] }
  0x6e   : > { %2506 = sst [smem:[#allocation18_spill]] %s1489_s5  ;;  %v2477_v20 = vstv %s1489_s5 }
  0x6f   : > { %v534_v17 = vstv %s1491_s6  ;;  %s2508_s5 = sld [smem:[#allocation16_spill]] }
  0x70   : > { %s2066_s6 = sld [smem:[#allocation6 + $0x41]] }
  0x8b   : > { %v155_v42 = vpop.permute.xlu2 %154 }
  0x8c   : > { %v162_v57 = vsel %vm158_vm2, 0.0, %v155_v42 }
  0x8d   : > { %v1531_v6 = vmul.f32 %v2475_v46, %v162_v57 }
  0x8f   : > { %v1572_v24 = vmul.f32 %v290_v62, %v1531_v6  ;;  %v1575_v26 = vmul.f32 %v237_v61, %v1531_v6  ;;  %v1578_v28 = vmul.f32 %v343_v3, %v1531_v6  ;;  %v1581_v29 = vmul.f32 %v438_v11, %v1531_v6 }
  0x93   : > { %v157_v52 = vpop.permute.xlu2 %156 }
  0x94   : > { %v159_v7 = vsel %vm158_vm2, %v155_v42, %v157_v52  ;;  %v2485_v52 = vstv %s1516_s1  ;;  %v2497_v42 = vstv %s1524_s15 }
  0x95   : > { %v1560_v18 = vmul.f32 %v2474_v49, %v159_v7  ;;  %v2489_v49 = vstv %s1545_s10 }
  0x97   : > { %2507 = vst [vmem:[#allocation19_spill] sm:$0xff] %v1560_v18  ;;  %v1605_v38 = vmul.f32 %v237_v61, %v1560_v18  ;;  %v1611_v57 = vmul.f32 %v343_v3, %v1560_v18  ;;  %v1614_v58 = vmul.f32 %v290_v62, %v1560_v18  ;;  %v1620_v63 = vmul.f32 %v2476_v16, %v1560_v18 }
  0x98   : > { %v1625_v61 = vmul.f32 %v2477_v20, %v1397_v27  ;;  %v1628_v7 = vmul.f32 %v438_v11, %v1560_v18  ;;  %v1631_v3 = vmul.f32 %v444_v5, %v1397_v27  ;;  %v1636_v62 = vmul.f32 %v2478_v22, %v1560_v18 }
  0x99   : > { %v1646_v11 = vmul.f32 %v2479_v33, %v1397_v27 }
  0x9b   : > { %v1569_v23 = vpop.permute.xlu2 %190 }
  0xa2   : > { %v137_v5 = vpop.permute.xlu1 %136  ;;  %v120_v20 = vpop.permute.xlu0 %119 }
  0xa3   : > { %v144_v46 = vsel %vm140_vm3, 0.0, %v137_v5  ;;  %v127_v16 = vsel %vm123_vm4, 0.0, %v120_v20  ;;  %v1654_v33 = vpop.permute.xlu2 %210 }
  0xa4   : > { %v1660_v22 = vmul.f32 %v2491_v47, %v144_v46  ;;  %v1664_v59 = vmul.f32 %v2481_v48, %v127_v16  ;;  %v216_v35 = vsel %vm212_vm5, %v1654_v33, 0.0 }
  0xa5   : > { %v1671_v39 = vmul.f32 %v2482_v34, %v216_v35 }
  0xa6   : > { %v281_v46 = vmul.f32 %v2484_v54, %v1664_v59  ;;  %v285_v16 = vmul.f32 %v2483_v55, %v1660_v22  ;;  %v228_v48 = vmul.f32 %v2490_v51, %v1664_v59  ;;  %v232_v35 = vmul.f32 %v2487_v53, %v1660_v22 }
  0xa7   : > { %v1691_v34 = vmul.f32 %v2485_v52, %v1671_v39  ;;  %v334_v21 = vmul.f32 %v2486_v56, %v1664_v59  ;;  %v338_v30 = vmul.f32 %v2488_v60, %v1660_v22  ;;  %v1702_v13 = vmul.f32 %v2489_v49, %v1671_v39 }
  0xa8   : > { %v287_v12 = vadd.f32 %v285_v16, %v281_v46  ;;  %v234_v55 = vadd.f32 %v232_v35, %v228_v48  ;;  %v1707_v54 = vmul.f32 %v2497_v42, %v1671_v39  ;;  %v429_v52 = vmul.f32 %v428_v0, %v1664_v59 }
  0xa9   : > { %v340_v56 = vadd.f32 %v338_v30, %v334_v21  ;;  %v433_v53 = vmul.f32 %v432_v4, %v1660_v22  ;;  %v2493_v60 = vstv %s1641_s26  ;;  %v1719_v49 = vmul.f32 %v2496_v14, %v1671_v39 }
  0xaa   : > { %v139_v51 = vpop.permute.xlu1 %138  ;;  %v122_v47 = vpop.permute.xlu0 %121  ;;  %v293_v48 = vadd.f32 %v1572_v24, %v287_v12  ;;  %v240_v46 = vadd.f32 %v1575_v26, %v234_v55  ;;  %v1726_v16 = vmul.f32 %v2493_v60, %v1671_v39  ;;  %v1733_v21 = vmul.f32 %v534_v17, %v1664_v59 }
  0xab   : > { %v141_v30 = vsel %vm140_vm3, %v137_v5, %v139_v51  ;;  %v124_v12 = vsel %vm123_vm4, %v120_v20, %v122_v47  ;;  %v1737_v55 = vpop.permute.xlu2 %598  ;;  %v346_v24 = vadd.f32 %v1578_v28, %v340_v56  ;;  %v435_v26 = vadd.f32 %v433_v53, %v429_v52 }
  0xac   : > { %v1742_v35 = vmul.f32 %v2494_v50, %v141_v30  ;;  %v1746_v60 = vmul.f32 %v2495_v1, %v124_v12  ;;  %v605_v51 = vsel %vm140_vm3, 0.0, %v1737_v55  ;;  %v299_v47 = vadd.f32 %v1535_v8, %v293_v48 }
  0xad   : > { %v2509_v20 = vperm.slane %v1485_v44, 0  ;;  %v246_v53 = vadd.f32 %v1538_v9, %v240_v46  ;;  %v352_v56 = vadd.f32 %v1543_v10, %v346_v24  ;;  %v441_v28 = vadd.f32 %v1581_v29, %v435_v26 }
  0xae   : > { %v2510_v52 = vstv %s1435_s7  ;;  %v2511_v12 = vstv %s1437_s8  ;;  %v2512_v48 = vstv %s2508_s5  ;;  %v2514_v9 = vstv %s1443_s11  ;;  %s1816_s7 = sld [smem:[#allocation6 + $0x30]]  ;;  %s1341_s8 = smov 32  }
  0xaf   : > { %v1753_v5 = vmul.f32 %v605_v51, %v2509_v20  ;;  %v229_v30 = vmul.f32 %v2510_v52, %v1746_v60  ;;  %v233_v8 = vmul.f32 %v2511_v12, %v1742_v35  ;;  %v335_v51 = vmul.f32 %v2512_v48, %v1746_v60  ;;  %s1936_s11 = sld [smem:[#allocation6 + $0x34]] }
  0xb0   : > { %v2513_v20 = vstv %s1453_s16  ;;  %v282_v10 = vmul.f32 %v2514_v9, %v1746_v60  ;;  %v2515_v46 = vstv %s1445_s12  ;;  %v447_v24 = vadd.f32 %v1552_v15, %v441_v28  ;;  %s1949_s12 = sld [smem:[#allocation6 + $0x35]] }
  0xb1   : > { %v339_v50 = vmul.f32 %v2513_v20, %v1742_v35  ;;  %v286_v29 = vmul.f32 %v2515_v46, %v1742_v35  ;;  %v2516_v26 = vstv %s1475_s28  ;;  %v235_v12 = vadd.f32 %v233_v8, %v229_v30  ;;  %s1965_s16 = sld [smem:[#allocation6 + $0x37]] }
  0xb2   : > { %v483_v52 = vmul.f32 %v2516_v26, %v1746_v60  ;;  %v2517_v48 = vstv %s1477_s29  ;;  %v430_v20 = vmul.f32 %v428_v0, %v1746_v60  ;;  %v434_v9 = vmul.f32 %v432_v4, %v1742_v35  ;;  %v175_v26 = vpop.permute.xlu1 %174  ;;  %v173_v27 = vpop.permute.xlu0 %172  ;;  %s2056_s5 = sld [smem:[#allocation6 + $0x40]] }
  0xb3   : > { %v341_v1 = vadd.f32 %v339_v50, %v335_v51  ;;  %v487_v14 = vmul.f32 %v2517_v48, %v1742_v35  ;;  %v288_v42 = vadd.f32 %v286_v29, %v282_v10  ;;  %v536_v15 = vmul.f32 %v534_v17, %v1746_v60  ;;  %v1800_v17 = vpop.permute.xlu2 %610 }
  0xb4   : > { %v2518_v28 = vstv %s1495_s20  ;;  %v241_v50 = vadd.f32 %v1605_v38, %v235_v12  ;;  %v180_v0 = vsel %vm176_vm6, %v175_v26, 0.0  ;;  %v177_v4 = vsel %vm176_vm6, %v173_v27, %v175_v26 }
  0xb5   : > { %v540_v46 = vmul.f32 %v2518_v28, %v1742_v35  ;;  %v347_v30 = vadd.f32 %v1611_v57, %v341_v1  ;;  %v489_v8 = vadd.f32 %v487_v14, %v483_v52  ;;  %v294_v10 = vadd.f32 %v1614_v58, %v288_v42 }
  0xb6   : > { %v436_v29 = vadd.f32 %v434_v9, %v430_v20  ;;  %v2519_v38 = vperm.slane %v1522_v2, 1  ;;  %v2521_v14 = vperm.slane %v1522_v2, 0  ;;  %v247_v52 = vadd.f32 %v1587_v31, %v241_v50 }
  0xb7   : > { %v353_v27 = vadd.f32 %v1590_v32, %v347_v30  ;;  %v300_v12 = vadd.f32 %v1598_v36, %v294_v10  ;;  %v495_v48 = vadd.f32 %v1620_v63, %v489_v8  ;;  %v542_v58 = vadd.f32 %v540_v46, %v536_v15 }
  0xb8   : > { %v1805_v1 = vmul.f32 %v2519_v38, %v180_v0  ;;  %v1809_v57 = vmul.f32 %v2521_v14, %v177_v4  ;;  %v442_v42 = vadd.f32 %v1628_v7, %v436_v29  ;;  %v2522_v20 = vstv %s1463_s23  ;;  %s2558_s23 = sld [smem:[#allocation18_spill]] }
  0xb9   : > { %v2523_v28 = vstv %s1465_s24  ;;  %v2524_v31 = vmov %v2522_v20  ;;  %v2525_v32 = vstv %s1467_s0  ;;  %v2528_v30 = vstv %s1473_s27  ;;  %s1997_s24 = sld [smem:[#allocation6 + $0x3a]]  ;;  %s1342_s0 = smov 16  }
  0xba   : > { %2520 = vst [vmem:[#allocation20_spill] sm:$0xff] %v1805_v1  ;;  %v251_v9 = vmul.f32 %v2522_v20, %v1805_v1  ;;  %v303_v26 = vmul.f32 %v2523_v28, %v1809_v57  ;;  %v250_v50 = vmul.f32 %v2524_v31, %v1809_v57  ;;  %v356_v36 = vmul.f32 %v2525_v32, %v1809_v57  ;;  %v193_v51 = vpop.permute.xlu0 %192  ;;  %s2022_s27 = sld [smem:[#allocation6 + $0x3b]] }
  0xbb   : > { %v2526_v63 = vmov %v2525_v32  ;;  %v2527_v15 = vmov %v2523_v28  ;;  %v451_v8 = vmul.f32 %v2528_v30, %v1809_v57  ;;  %v501_v0 = vadd.f32 %v1625_v61, %v495_v48 }
  0xbc   : > { %v357_v7 = vmul.f32 %v2526_v63, %v1805_v1  ;;  %v304_v46 = vmul.f32 %v2527_v15, %v1805_v1  ;;  %v253_v4 = vadd.f32 %v251_v9, %v247_v52  ;;  %v305_v10 = vadd.f32 %v303_v26, %v299_v47  ;;  %v209_v63 = vpop.permute.xlu1 %208 }
  0xbd   : > { %v252_v29 = vadd.f32 %v250_v50, %v246_v53  ;;  %v358_v38 = vadd.f32 %v356_v36, %v352_v56  ;;  %v453_v28 = vadd.f32 %v451_v8, %v447_v24  ;;  %v2529_v31 = vstv %s1555_s13 }
  0xbe   : > { %v359_v14 = vadd.f32 %v357_v7, %v353_v27  ;;  %v306_v20 = vadd.f32 %v304_v46, %v300_v12  ;;  %v505_v32 = vmul.f32 %v2529_v31, %v1805_v1  ;;  %v448_v15 = vadd.f32 %v1631_v3, %v442_v42  ;;  %v1856_v27 = vpop.permute.xlu2 %628 }
  0xbf   : > { %v452_v61 = vmul.f32 %v2528_v30, %v1805_v1  ;;  %v548_v47 = vadd.f32 %v1636_v62, %v542_v58  ;;  %v2530_v53 = vstv %s1567_s14  ;;  %v213_v24 = vsel %vm212_vm5, %v209_v63, %v1654_v33 }
  0xc0   : > { %v558_v56 = vmul.f32 %v2530_v53, %v1805_v1  ;;  %v195_v52 = vsel %vm194_vm7, %v1569_v23, %v193_v51  ;;  %v198_v3 = vsel %vm194_vm7, %v193_v51, 0.0  ;;  %v507_v62 = vadd.f32 %v505_v32, %v501_v0 }
  0xc1   : > { %v2531_v12 = vperm.slane %v1562_v19, 0  ;;  %v2532_v42 = vperm.slane %v1602_v37, 0  ;;  %v2533_v58 = vperm.slane %v1602_v37, 1  ;;  %v454_v9 = vadd.f32 %v452_v61, %v448_v15 }
  0xc2   : > { %v554_v51 = vadd.f32 %v1646_v11, %v548_v47  ;;  %v2534_v50 = vstv %s1495_s20  ;;  %v2535_v7 = vstv %s1501_s21  ;;  %v2536_v8 = vstv %s1479_s30  ;;  %s1911_s20 = sld [smem:[#allocation6 + $0x31]]  ;;  %v589_v18 = vpop.permute.xlu0 %588 }
  0xc3   : > { %v1860_v48 = vmul.f32 %v2531_v12, %v213_v24  ;;  %v1864_v33 = vmul.f32 %v2532_v42, %v195_v52  ;;  %v1868_v23 = vmul.f32 %v2533_v58, %v198_v3  ;;  %v539_v36 = vmul.f32 %v2534_v50, %v1660_v22  ;;  %s1914_s21 = sld [smem:[#allocation6 + $0x32]] }
  0xc4   : > { %v545_v46 = vmul.f32 %v2535_v7, %v1531_v6  ;;  %v2537_v31 = vstv %s1506_s2  ;;  %v2538_v63 = vstv %s1524_s15  ;;  %v2539_v11 = vmov %v2536_v8  ;;  %s1340_s2 = smov 48   ;;  %s1958_s15 = sld [smem:[#allocation6 + $0x36]] }
  0xc5   : > { %v257_v0 = vmul.f32 %v2536_v8, %v1868_v23  ;;  %v309_v32 = vmul.f32 %v2537_v31, %v1864_v33  ;;  %v315_v15 = vmul.f32 %v2538_v63, %v1860_v48  ;;  %v256_v30 = vmul.f32 %v2539_v11, %v1864_v33  ;;  %s2045_s30 = sld [smem:[#allocation6 + $0x3e]] }
  0xc6   : > { %v2540_v61 = vstv %s1516_s1  ;;  %v2541_v53 = vstv %s1540_s9  ;;  %v2542_v52 = vstv %s1545_s10  ;;  %v2544_v8 = vmov %v2537_v31  ;;  %s1921_s1 = sld [smem:[#allocation6 + $0x33]]  ;;  %s1343_s9 = smov 112  }
  0xc7   : > { %v262_v47 = vmul.f32 %v2540_v61, %v1860_v48  ;;  %v362_v24 = vmul.f32 %v2541_v53, %v1864_v33  ;;  %v368_v3 = vmul.f32 %v2542_v52, %v1860_v48  ;;  %v2543_v12 = vmov %v2541_v53  ;;  %v591_v52 = vpop.permute.xlu1 %590  ;;  %s1344_s10 = smov 96  }
  0xc8   : > { %v363_v42 = vmul.f32 %v2543_v12, %v1868_v23  ;;  %v259_v58 = vadd.f32 %v257_v0, %v253_v4  ;;  %v311_v50 = vadd.f32 %v309_v32, %v305_v10  ;;  %v258_v7 = vadd.f32 %v256_v30, %v252_v29  ;;  %v1919_v0 = vpop.permute.xlu2 %640 }
  0xc9   : > { %v310_v31 = vmul.f32 %v2544_v8, %v1868_v23  ;;  %v364_v63 = vadd.f32 %v362_v24, %v358_v38  ;;  %v2545_v26 = vstv %s1583_s17  ;;  %v2546_v1 = vstv %s1592_s18  ;;  %s2121_s18 = sld [smem:[#allocation6 + $0x45]] }
  0xca   : > { %v365_v11 = vadd.f32 %v363_v42, %v359_v14  ;;  %v457_v61 = vmul.f32 %v2545_v26, %v1864_v33  ;;  %v463_v53 = vmul.f32 %v2546_v1, %v1860_v48  ;;  %v265_v12 = vadd.f32 %v1691_v34, %v259_v58 }
  0xcb   : > { %v317_v4 = vadd.f32 %v315_v15, %v311_v50  ;;  %v264_v10 = vadd.f32 %v262_v47, %v258_v7  ;;  %v312_v29 = vadd.f32 %v310_v31, %v306_v20  ;;  %v592_v38 = vsel %vm123_vm4, %v589_v18, %v591_v52 }
  0xcc   : > { %v595_v14 = vsel %vm123_vm4, 0.0, %v589_v18  ;;  %v370_v26 = vadd.f32 %v368_v3, %v364_v63  ;;  %v371_v1 = vadd.f32 %v1702_v13, %v365_v11  ;;  %v2547_v34 = vperm.slane %v1487_v45, 0  ;;  %270 = vrot.lane.b32.xlu1 %v265_v12, %s1340_s2 }
  0xcd   : > { %v2548_v20 = vperm.slane %v1487_v45, 1  ;;  %321 = vrot.lane.b32.xlu2 %v317_v4, %s1341_s8  ;;  %v318_v13 = vadd.f32 %v1707_v54, %v312_v29  ;;  %v645_v18 = vsel %vm212_vm5, %v1919_v0, 0.0  ;;  %268 = vrot.lane.b32.xlu0 %v264_v10, %s1340_s2  ;;  %v459_v45 = vadd.f32 %v457_v61, %v453_v28 }
  0xce   : > { %v1925_v32 = vmul.f32 %v595_v14, %v2547_v34  ;;  %v2549_v30 = vstv %s1600_s25  ;;  %v2550_v24 = vstv %s1583_s17  ;;  %v2551_v42 = vperm.slane %v1562_v19, 1  ;;  %v601_v34 = vpop.permute.xlu0 %600  ;;  %s2113_s17 = sld [smem:[#allocation6 + $0x44]] }
  0xcf   : > { %v1929_v15 = vmul.f32 %v592_v38, %v2548_v20  ;;  %v511_v47 = vmul.f32 %v2549_v30, %v1868_v23  ;;  %v458_v3 = vmul.f32 %v2550_v24, %v1868_v23  ;;  %v560_v58 = vadd.f32 %v558_v56, %v554_v51  ;;  %v609_v14 = vpop.permute.xlu1 %608 }
  0xd0   : > { %v1947_v54 = vmul.f32 %v645_v18, %v2551_v42  ;;  %v2552_v50 = vstv %s1728_s4  ;;  %v2553_v28 = vstv %s1816_s7  ;;  %v541_v31 = vadd.f32 %v539_v36, %v1733_v21  ;;  %s2051_s4 = sld [smem:[#allocation6 + $0x3f]] }
  0xd1   : > { %v564_v7 = vmul.f32 %v2552_v50, %v1868_v23  ;;  %v570_v8 = vmul.f32 %v2553_v28, %v1671_v39  ;;  %v1960_v63 = vadd.f32 %v463_v53, %v459_v45  ;;  %v513_v11 = vadd.f32 %v511_v47, %v507_v62  ;;  %s2150_s7 = sld [smem:[#allocation6 + $0x4e]] }
  0xd2   : > { %v460_v61 = vadd.f32 %v458_v3, %v454_v9  ;;  %v2554_v52 = vstv %s1513_s3  ;;  %v547_v51 = vadd.f32 %v545_v46, %v541_v31  ;;  %v2556_v4 = vstv %s1567_s14  ;;  %s1987_s3 = sld [smem:[#allocation6 + $0x39]] }
  0xd3   : > { %v551_v12 = vmul.f32 %v2554_v52, %v1389_v25  ;;  %v566_v56 = vadd.f32 %v564_v7, %v560_v58  ;;  %v557_v10 = vmul.f32 %v2556_v4, %v1809_v57  ;;  %v2557_v21 = vmov %v2552_v50  ;;  %s2106_s14 = sld [smem:[#allocation6 + $0x43]] }
  0xd4   : > { %v563_v36 = vmul.f32 %v2557_v21, %v1864_v33  ;;  %v1976_v62 = vadd.f32 %v1726_v16, %v513_v11  ;;  %v1979_v9 = vadd.f32 %v1719_v49, %v460_v61  ;;  %v2559_v53 = vmov %v2553_v28  ;;  %374 = vrot.lane.b32.xlu1 %v370_v26, %s1342_s0 }
  0xd5   : > { %v569_v29 = vmul.f32 %v2559_v53, %v1860_v48  ;;  %v2560_v46 = vstv %s1475_s28  ;;  %v1989_v20 = vadd.f32 %v570_v8, %v566_v56  ;;  %v553_v18 = vadd.f32 %v551_v12, %v547_v51  ;;  %376 = vrot.lane.b32.xlu2 %v371_v1, %s1342_s0  ;;  %323 = vrot.lane.b32.xlu0 %v318_v13, %s1341_s8  ;;  %s2031_s28 = sld [smem:[#allocation6 + $0x3c]] }
  0xd6   : > { %v482_v38 = vmul.f32 %v2560_v46, %v1664_v59  ;;  %v2561_v16 = vstv %s1477_s29  ;;  %v2562_v49 = vstv %s2555_s19  ;;  %v615_v47 = vsel %vm158_vm2, 0.0, %v609_v14  ;;  %s2041_s29 = sld [smem:[#allocation6 + $0x3d]] }
  0xd7   : > { %v486_v45 = vmul.f32 %v2561_v16, %v1660_v22  ;;  %v492_v30 = vmul.f32 %v2562_v49, %v1531_v6  ;;  %v602_v24 = vsel %vm140_vm3, %v1737_v55, %v601_v34  ;;  %v612_v3 = vsel %vm158_vm2, %v609_v14, %v1800_v17  ;;  %v621_v49 = vpop.permute.xlu1 %620  ;;  %s2197_s19 = sld [smem:[#allocation6 + $0x56]] }
  0xd8   : > { %v2563_v42 = vstv %s2558_s23  ;;  %v2564_v50 = vperm.slane %v1483_v43, 0  ;;  %v2565_v28 = vperm.slane %v1485_v44, 1  ;;  %v2566_v31 = vperm.slane %v1483_v43, 1  ;;  %s2209_s23 = sld [smem:[#allocation6 + $0x57]] }
  0xd9   : > { %v498_v58 = vmul.f32 %v2563_v42, %v1389_v25  ;;  %v649_v17 = vstv %s1911_s20  ;;  %v559_v44 = vadd.f32 %v557_v10, %v553_v18  ;;  %v488_v11 = vadd.f32 %v486_v45, %v482_v38  ;;  %s2164_s20 = sld [smem:[#allocation6 + $0x4f]] }
  0xda   : > { %v2009_v7 = vmul.f32 %v615_v47, %v2564_v50  ;;  %v2013_v8 = vmul.f32 %v602_v24, %v2565_v28  ;;  %v2017_v55 = vmul.f32 %v612_v3, %v2566_v31  ;;  %v2567_v61 = vstv %s1555_s13  ;;  %s2086_s13 = sld [smem:[#allocation6 + $0x42]] }
  0xdb   : > { %v504_v43 = vmul.f32 %v2567_v61, %v1809_v57  ;;  %v2568_v52 = vstv %s1600_s25  ;;  %v2569_v26 = vstv %s1641_s26  ;;  %v651_v13 = vmul.f32 %v649_v17, %v1929_v15  ;;  %s1345_s25 = smov 80   ;;  %s2145_s26 = sld [smem:[#allocation6 + $0x4d]] }
  0xdc   : > { %v510_v12 = vmul.f32 %v2568_v52, %v1864_v33  ;;  %v516_v1 = vmul.f32 %v2569_v26, %v1860_v48  ;;  %v653_v56 = vstv %s1914_s21  ;;  %v659_v51 = vstv %s1921_s1  ;;  %469 = vrot.lane.b32.xlu1 %v1960_v63, %s1343_s9  ;;  %s2170_s21 = sld [smem:[#allocation6 + $0x50]] }
  0xdd   : > { %v565_v4 = vadd.f32 %v563_v36, %v559_v44  ;;  %v494_v10 = vadd.f32 %v492_v30, %v488_v11  ;;  %v655_v21 = vmul.f32 %v653_v56, %v2013_v8  ;;  %v661_v53 = vmul.f32 %v659_v51, %v2017_v55  ;;  %v619_v30 = vpop.permute.xlu0 %618  ;;  %524 = vrot.lane.b32.xlu2 %v1976_v62, %s1344_s10  ;;  %s2174_s1 = sld [smem:[#allocation6 + $0x51]] }
  0xde   : > { %v665_v46 = vstv %s1936_s11  ;;  %v671_v38 = vstv %s1949_s12  ;;  %v677_v14 = vstv %s1958_s15  ;;  %v683_v34 = vstv %s1965_s16  ;;  %s2178_s11 = sld [smem:[#allocation6 + $0x52]] }
  0xdf   : > { %v2053_v18 = vadd.f32 %v569_v29, %v565_v4  ;;  %v500_v36 = vadd.f32 %v498_v58, %v494_v10  ;;  %v657_v16 = vadd.f32 %v655_v21, %v651_v13  ;;  %v667_v45 = vmul.f32 %v665_v46, %v1413_v40  ;;  %471 = vrot.lane.b32.xlu0 %v1979_v9, %s1343_s9  ;;  %s2183_s12 = sld [smem:[#allocation6 + $0x53]] }
  0xe0   : > { %v2061_v47 = vmul.f32 %v683_v34, %v1947_v54  ;;  %v701_v24 = vstv %s1973_s22  ;;  %v705_v3 = vstv %s1987_s3  ;;  %v711_v42 = vstv %s1997_s24  ;;  %s2187_s15 = sld [smem:[#allocation6 + $0x54]] }
  0xe1   : > { %v625_v29 = vsel %vm176_vm6, %v621_v49, 0.0  ;;  %v622_v58 = vsel %vm176_vm6, %v619_v30, %v621_v49  ;;  %v506_v50 = vadd.f32 %v504_v43, %v500_v36  ;;  %v663_v28 = vadd.f32 %v661_v53, %v657_v16  ;;  %s2194_s16 = sld [smem:[#allocation6 + $0x55]] }
  0xe2   : > { %v2570_v31 = vperm.slane %v1522_v2, 1  ;;  %v2571_v11 = vperm.slane %v1522_v2, 0  ;;  %v702_v43 = vmul.f32 %v701_v24, %v1925_v32  ;;  %v717_v52 = vstv %s2022_s27  ;;  %s2216_s22 = sld [smem:[#allocation6 + $0x58]] }
  0xe3   : > { %v512_v2 = vadd.f32 %v510_v12, %v506_v50  ;;  %v669_v26 = vadd.f32 %v667_v45, %v663_v28  ;;  %v706_v63 = vmul.f32 %v705_v3, %v1753_v5  ;;  %v712_v13 = vmul.f32 %v711_v42, %v2009_v7  ;;  %s2231_s3 = sld [smem:[#allocation6 + $0x5a]] }
  0xe4   : > { %v2072_v44 = vmul.f32 %v625_v29, %v2570_v31  ;;  %v2076_v61 = vmul.f32 %v622_v58, %v2571_v11  ;;  %v718_v4 = vmul.f32 %v717_v52, %v1415_v41  ;;  %v723_v10 = vstv %s2031_s28  ;;  %v639_v31 = vpop.permute.xlu1 %638  ;;  %577 = vrot.lane.b32.xlu1 %v1989_v20, %s1345_s25  ;;  %s2244_s24 = sld [smem:[#allocation6 + $0x5b]] }
  0xe5   : > { %v729_v21 = vstv %s2041_s29  ;;  %v518_v53 = vadd.f32 %v516_v1, %v512_v2  ;;  %v708_v36 = vadd.f32 %v706_v63, %v702_v43  ;;  %v735_v12 = vstv %s2045_s30  ;;  %v631_v28 = vpop.permute.xlu0 %630  ;;  %575 = vrot.lane.b32.xlu2 %v2053_v18, %s1345_s25  ;;  %s2249_s27 = sld [smem:[#allocation6 + $0x5c]] }
  0xe6   : > { %v673_v62 = vmul.f32 %v671_v38, %v2072_v44  ;;  %v724_v9 = vmul.f32 %v723_v10, %v2076_v61  ;;  %v650_v45 = vmul.f32 %v649_v17, %v1925_v32  ;;  %v654_v49 = vmul.f32 %v653_v56, %v1753_v5  ;;  %s2255_s28 = sld [smem:[#allocation6 + $0x5d]] }
  0xe7   : > { %v660_v30 = vmul.f32 %v659_v51, %v2009_v7  ;;  %v714_v1 = vadd.f32 %v712_v13, %v708_v36  ;;  %v666_v29 = vmul.f32 %v665_v46, %v1415_v41  ;;  %v672_v58 = vmul.f32 %v671_v38, %v2076_v61  ;;  %522 = vrot.lane.b32.xlu0 %v518_v53, %s1344_s10  ;;  %s2262_s29 = sld [smem:[#allocation6 + $0x5e]] }
  0xe8   : > { %v675_v16 = vadd.f32 %v673_v62, %v669_v26  ;;  %v753_v50 = vstv %s2051_s4  ;;  %v656_v11 = vadd.f32 %v654_v49, %v650_v45  ;;  %v757_v2 = vstv %s2056_s5  ;;  %s2270_s30 = sld [smem:[#allocation6 + $0x5f]] }
  0xe9   : > { %v754_v43 = vmul.f32 %v753_v50, %v1925_v32  ;;  %v763_v17 = vstv %s2066_s6  ;;  %v632_v56 = vsel %vm194_vm7, %v1856_v27, %v631_v28  ;;  %v635_v51 = vsel %vm194_vm7, %v631_v28, 0.0  ;;  %s2277_s4 = sld [smem:[#allocation6 + $0x60]] }
  0xea   : > { %v642_v46 = vsel %vm212_vm5, %v639_v31, %v1919_v0  ;;  %v720_v38 = vadd.f32 %v718_v4, %v714_v1  ;;  %v2572_v26 = vperm.slane %v1602_v37, 0  ;;  %v2573_v13 = vperm.slane %v1602_v37, 1  ;;  %s1159_s5 = sld [smem:[#allocation6 + $0x47]] }
  0xeb   : > { %v2574_v36 = vperm.slane %v1562_v19, 0  ;;  %v769_v0 = vstv %s2086_s13  ;;  %v662_v4 = vadd.f32 %v660_v30, %v656_v11  ;;  %v758_v19 = vmul.f32 %v757_v2, %v1753_v5  ;;  %s1160_s6 = sld [smem:[#allocation6 + $0x48]] }
  0xec   : > { %v2130_v63 = vmul.f32 %v632_v56, %v2572_v26  ;;  %v2134_v62 = vmul.f32 %v635_v51, %v2573_v13  ;;  %v726_v37 = vadd.f32 %v724_v9, %v720_v38  ;;  %v764_v45 = vmul.f32 %v763_v17, %v2009_v7  ;;  %s1162_s13 = sld [smem:[#allocation6 + $0x4a]] }
  0xed   : > { %v2138_v27 = vmul.f32 %v642_v46, %v2574_v36  ;;  %v668_v9 = vadd.f32 %v666_v29, %v662_v4  ;;  %v760_v1 = vadd.f32 %v758_v19, %v754_v43  ;;  %v770_v28 = vmul.f32 %v769_v0, %v1415_v41 }
  0xee   : > { %v679_v20 = vmul.f32 %v677_v14, %v2134_v62  ;;  %v730_v18 = vmul.f32 %v729_v21, %v2130_v63  ;;  %v678_v53 = vmul.f32 %v677_v14, %v2130_v63  ;;  %v775_v56 = vstv %s2106_s14  ;;  %s2358_s14 = sld [smem:[#allocation6 + $0x4c]] }
  0xef   : > { %v736_v49 = vmul.f32 %v735_v12, %v2138_v27  ;;  %v684_v30 = vmul.f32 %v683_v34, %v2138_v27  ;;  %v781_v51 = vstv %s2113_s17  ;;  %v674_v46 = vadd.f32 %v672_v58, %v668_v9  ;;  %s1109_s17 = sld [smem:[#allocation6 + $0x15]] }
  0xf0   : > { %v681_v31 = vadd.f32 %v679_v20, %v675_v16  ;;  %v732_v11 = vadd.f32 %v730_v18, %v726_v37  ;;  %v766_v14 = vadd.f32 %v764_v45, %v760_v1  ;;  %v776_v38 = vmul.f32 %v775_v56, %v2076_v61 }
  0xf1   : > { %v782_v29 = vmul.f32 %v781_v51, %v2130_v63  ;;  %v787_v26 = vstv %s2121_s18  ;;  %v755_v13 = vmul.f32 %v753_v50, %v1929_v15  ;;  %v680_v16 = vadd.f32 %v678_v53, %v674_v46  ;;  %s1110_s18 = sld [smem:[#allocation6 + $0x16]] }
  0xf2   : > { %v687_v34 = vadd.f32 %v2061_v47, %v681_v31  ;;  %v738_v43 = vadd.f32 %v736_v49, %v732_v11  ;;  %v772_v36 = vadd.f32 %v770_v28, %v766_v14  ;;  %v788_v58 = vmul.f32 %v787_v26, %v2138_v27 }
  0xf3   : > { %v759_v37 = vmul.f32 %v757_v2, %v2013_v8  ;;  %v765_v47 = vmul.f32 %v763_v17, %v2017_v55  ;;  %v771_v50 = vmul.f32 %v769_v0, %v1413_v40  ;;  %v777_v4 = vmul.f32 %v775_v56, %v2072_v44 }
  0xf4   : > { %692 = vrot.lane.b32.xlu1 %v687_v34, %s1340_s2  ;;  %742 = vrot.lane.b32.xlu2 %v738_v43, %s1341_s8  ;;  %v686_v19 = vadd.f32 %v684_v30, %v680_v16  ;;  %v778_v45 = vadd.f32 %v776_v38, %v772_v36  ;;  %v847_v20 = vstv %s2145_s26  ;;  %v783_v18 = vmul.f32 %v781_v51, %v2134_v62  ;;  %s2378_s26 = sld [smem:[#allocation6 + $0x18]] }
  0xf5   : > { %v761_v2 = vadd.f32 %v759_v37, %v755_v13  ;;  %v703_v17 = vmul.f32 %v701_v24, %v1929_v15  ;;  %v707_v0 = vmul.f32 %v705_v3, %v2013_v8  ;;  %v713_v49 = vmul.f32 %v711_v42, %v2017_v55 }
  0xf6   : > { %690 = vrot.lane.b32.xlu0 %v686_v19, %s1340_s2  ;;  %v784_v53 = vadd.f32 %v782_v29, %v778_v45  ;;  %v789_v30 = vmul.f32 %v787_v26, %v1947_v54  ;;  %v719_v24 = vmul.f32 %v717_v52, %v1413_v40  ;;  %v725_v42 = vmul.f32 %v723_v10, %v2072_v44  ;;  %s2227_s2 = sld [smem:[#allocation6 + $0x59]] }
  0xf7   : > { %v767_v9 = vadd.f32 %v765_v47, %v761_v2  ;;  %v709_v3 = vadd.f32 %v707_v0, %v703_v17  ;;  %v731_v1 = vmul.f32 %v729_v21, %v2134_v62  ;;  %v848_v28 = vmul.f32 %v847_v20, %v1925_v32 }
  0xf8   : > { %v790_v31 = vadd.f32 %v788_v58, %v784_v53  ;;  %v851_v52 = vstv %s2150_s7  ;;  %v857_v56 = vstv %s2164_s20  ;;  %v863_v14 = vstv %s2170_s21  ;;  %s2380_s7 = sld [smem:[#allocation6 + $0x19]] }
  0xf9   : > { %v773_v11 = vadd.f32 %v771_v50, %v767_v9  ;;  %v715_v51 = vadd.f32 %v713_v49, %v709_v3  ;;  %v852_v46 = vmul.f32 %v851_v52, %v1753_v5  ;;  %v858_v10 = vmul.f32 %v857_v56, %v2009_v7  ;;  %s2386_s20 = sld [smem:[#allocation6 + $0x1a]] }
  0xfa   : > { %v737_v38 = vmul.f32 %v735_v12, %v1947_v54  ;;  %v869_v29 = vstv %s2174_s1  ;;  %v875_v34 = vstv %s2178_s11  ;;  %v864_v13 = vmul.f32 %v863_v14, %v1415_v41  ;;  %s2391_s21 = sld [smem:[#allocation6 + $0x1b]] }
  0xfb   : > { %v779_v21 = vadd.f32 %v777_v4, %v773_v11  ;;  %v721_v43 = vadd.f32 %v719_v24, %v715_v51  ;;  %v854_v26 = vadd.f32 %v852_v46, %v848_v28  ;;  %v870_v16 = vmul.f32 %v869_v29, %v2076_v61  ;;  %s2578_s1 = sld [smem:[#allocation14_spill]] }
  0xfc   : > { %794 = vrot.lane.b32.xlu1 %v790_v31, %s1342_s0  ;;  %v876_v12 = vmul.f32 %v875_v34, %v2130_v63  ;;  %v881_v58 = vstv %s2183_s12  ;;  %v899_v37 = vstv %s2187_s15  ;;  %v903_v19 = vstv %s2194_s16 }
  0xfd   : > { %v785_v36 = vadd.f32 %v783_v18, %v779_v21  ;;  %v727_v47 = vadd.f32 %v725_v42, %v721_v43  ;;  %v860_v50 = vadd.f32 %v858_v10, %v854_v26  ;;  %v901_v4 = vmul.f32 %v899_v37, %v1929_v15 }
  0xfe   : > { %v905_v2 = vmul.f32 %v903_v19, %v2013_v8  ;;  %v909_v18 = vstv %s2197_s19  ;;  %v915_v17 = vstv %s2209_s23  ;;  %v921_v24 = vstv %s2216_s22 }
  0xff   : > { %v791_v45 = vadd.f32 %v789_v30, %v785_v36  ;;  %v733_v0 = vadd.f32 %v731_v1, %v727_v47  ;;  %v866_v49 = vadd.f32 %v864_v13, %v860_v50  ;;  %v911_v53 = vmul.f32 %v909_v18, %v2017_v55 }
 0x100   : > { %v917_v9 = vmul.f32 %v915_v17, %v1413_v40  ;;  %v907_v30 = vadd.f32 %v905_v2, %v901_v4  ;;  %v927_v3 = vstv %s2227_s2  ;;  %v933_v42 = vstv %s2231_s3 }
 0x101   : > { %796 = vrot.lane.b32.xlu2 %v791_v45, %s1342_s0  ;;  %v739_v28 = vadd.f32 %v737_v38, %v733_v0  ;;  %v872_v1 = vadd.f32 %v870_v16, %v866_v49  ;;  %v882_v31 = vmul.f32 %v881_v58, %v2138_v27  ;;  %v923_v51 = vmul.f32 %v921_v24, %v2072_v44  ;;  %s2294_s0 = sld [smem:[#allocation6 + $0x61]]  ;;  %s2579_s11 = sshll.u32 %s2578_s1, 3 }
 0x102   : > { %v913_v11 = vadd.f32 %v911_v53, %v907_v30  ;;  %v849_v46 = vmul.f32 %v847_v20, %v1929_v15  ;;  %v853_v10 = vmul.f32 %v851_v52, %v2013_v8  ;;  %v929_v38 = vmul.f32 %v927_v3, %v2134_v62  ;;  %s1055_s12 = scalar_lea.vmem [#allocation9], %s2579_s11  ;;  %s63_s1 = sadd.s32 1, %s2578_s1  }
 0x103   : > { %744 = vrot.lane.b32.xlu0 %v739_v28, %s1341_s8  ;;  %v878_v21 = vadd.f32 %v876_v12, %v872_v1  ;;  %v935_v43 = vmul.f32 %v933_v42, %v1947_v54  ;;  %v859_v26 = vmul.f32 %v857_v56, %v2017_v55  ;;  %v865_v20 = vmul.f32 %v863_v14, %v1413_v40  ;;  %s1158_s8 = sld [smem:[#allocation6 + $0x46]]  ;;  %p60_p0 = scmp.ge.s32.totalorder %s63_s1, 2  }
 0x104   : > { %v919_v13 = vadd.f32 %v917_v9, %v913_v11  ;;  %v855_v16 = vadd.f32 %v853_v10, %v849_v46  ;;  %v871_v52 = vmul.f32 %v869_v29, %v2072_v44  ;;  %v951_v12 = vstv %s2244_s24  ;;  %s2580_s19 = sld [smem:[#allocation21_spill]] (%p60_p0)  ;;  %s1346_s22 = smov (%p60_p0), [#allocation9]  }
 0x105   : > { %v884_v36 = vadd.f32 %v882_v31, %v878_v21  ;;  %v955_v47 = vstv %s2249_s27  ;;  %v961_v50 = vstv %s2255_s28  ;;  %v953_v2 = vmul.f32 %v951_v12, %v1929_v15  ;;  %s1061_s2 = sshll.u32 (%p60_p0), %s1346_s22, 4  ;;  %s2581_s3 = smov (%p60_p0), 8   ;;  %s1062_s2 = int_to_ptr.vmem [resolvable:$true] %s1061_s2 }
 0x106   : > { %v925_v4 = vadd.f32 %v923_v51, %v919_v13  ;;  %v861_v45 = vadd.f32 %v859_v26, %v855_v16  ;;  %v957_v56 = vmul.f32 %v955_v47, %v2013_v8  ;;  %v877_v0 = vmul.f32 %v875_v34, %v2134_v62  ;;  %s2582_s24 = smov (%p60_p0), 128  }
 0x107   : > { %888 = vrot.lane.b32.xlu1 %v884_v36, %s1343_s9  ;;  %v963_v14 = vmul.f32 %v961_v50, %v2017_v55  ;;  %v967_v49 = vstv %s2262_s29  ;;  %v973_v29 = vstv %s2270_s30  ;;  %v883_v1 = vmul.f32 %v881_v58, %v1947_v54 }
 0x108   : > { %v931_v53 = vadd.f32 %v929_v38, %v925_v4  ;;  %v867_v9 = vadd.f32 %v865_v20, %v861_v45  ;;  %v959_v30 = vadd.f32 %v957_v56, %v953_v2  ;;  %v969_v28 = vmul.f32 %v967_v49, %v1413_v40 }
 0x109   : > { %v979_v31 = vstv %s2277_s4  ;;  %v952_v11 = vmul.f32 %v951_v12, %v1925_v32  ;;  %v975_v10 = vmul.f32 %v973_v29, %v2072_v44  ;;  %v985_v21 = vstv %s2294_s0 }
 0x10a   : > { %v937_v51 = vadd.f32 %v935_v43, %v931_v53  ;;  %v873_v46 = vadd.f32 %v871_v52, %v867_v9  ;;  %v965_v34 = vadd.f32 %v963_v14, %v959_v30  ;;  %v956_v38 = vmul.f32 %v955_v47, %v1753_v5  ;;  %s1063_s23 = sshll.u32 (%p60_p0), %s2580_s19, 4  ;;  %s1064_s23 = int_to_ptr.hbm [resolvable:$true] %s1063_s23 }
 0x10b   : > { %v962_v26 = vmul.f32 %v961_v50, %v2009_v7  ;;  %v981_v16 = vmul.f32 %v979_v31, %v2134_v62  ;;  %v968_v20 = vmul.f32 %v967_v49, %v1415_v41  ;;  %v900_v43 = vmul.f32 %v899_v37, %v1925_v32 }
 0x10c   : > { %942 = vrot.lane.b32.xlu2 %v937_v51, %s1344_s10  ;;  %v879_v58 = vadd.f32 %v877_v0, %v873_v46  ;;  %v971_v13 = vadd.f32 %v969_v28, %v965_v34  ;;  %v958_v36 = vadd.f32 %v956_v38, %v952_v11  ;;  %v904_v52 = vmul.f32 %v903_v19, %v1753_v5 }
 0x10d   : > { %v910_v12 = vmul.f32 %v909_v18, %v2009_v7  ;;  %v987_v4 = vmul.f32 %v985_v21, %v1947_v54  ;;  %v974_v2 = vmul.f32 %v973_v29, %v2076_v61  ;;  %v916_v0 = vmul.f32 %v915_v17, %v1415_v41 }
 0x10e   : > { %v885_v47 = vadd.f32 %v883_v1, %v879_v58  ;;  %v977_v50 = vadd.f32 %v975_v10, %v971_v13  ;;  %v964_v45 = vadd.f32 %v962_v26, %v958_v36  ;;  %v906_v56 = vadd.f32 %v904_v52, %v900_v43 }
 0x10f   : > { %v980_v18 = vmul.f32 %v979_v31, %v2130_v63  ;;  %v922_v49 = vmul.f32 %v921_v24, %v2076_v61  ;;  %v986_v29 = vmul.f32 %v985_v21, %v2138_v27  ;;  %v928_v17 = vmul.f32 %v927_v3, %v2130_v63 }
 0x110   : > { %890 = vrot.lane.b32.xlu0 %v885_v47, %s1343_s9  ;;  %v983_v37 = vadd.f32 %v981_v16, %v977_v50  ;;  %v970_v19 = vadd.f32 %v968_v20, %v964_v45  ;;  %v912_v14 = vadd.f32 %v910_v12, %v906_v56  ;;  %s1161_s9 = sld [smem:[#allocation6 + $0x49]]  ;;  %v934_v31 = vmul.f32 %v933_v42, %v2138_v27 }
 0x111   : > { %v805_v46 = vstv %s1158_s8  ;;  %v809_v34 = vstv %s1159_s5  ;;  %v815_v26 = vstv %s1160_s6  ;;  %v827_v12 = vstv %s1162_s13 }
 0x112   : > { %v989_v53 = vadd.f32 %v987_v4, %v983_v37  ;;  %v976_v9 = vadd.f32 %v974_v2, %v970_v19  ;;  %v918_v30 = vadd.f32 %v916_v0, %v912_v14  ;;  %v806_v3 = vmul.f32 %v805_v46, %v1925_v32 }
 0x113   : > { %v807_v10 = vmul.f32 %v805_v46, %v1929_v15  ;;  %v810_v21 = vmul.f32 %v809_v34, %v1753_v5  ;;  %v811_v38 = vmul.f32 %v809_v34, %v2013_v8  ;;  %v816_v16 = vmul.f32 %v815_v26, %v2009_v7  ;;  %v2576_v46 = vld [vmem:[#allocation15_spill] sm:$0xff] }
 0x114   : > { %994 = vrot.lane.b32.xlu1 %v989_v53, %s1345_s25  ;;  %v982_v28 = vadd.f32 %v980_v18, %v976_v9  ;;  %v924_v1 = vadd.f32 %v922_v49, %v918_v30  ;;  %v817_v20 = vmul.f32 %v815_v26, %v2017_v55  ;;  %v828_v8 = vmul.f32 %v827_v12, %v2076_v61 }
 0x115   : > { %v812_v58 = vadd.f32 %v810_v21, %v806_v3  ;;  %v813_v13 = vadd.f32 %v811_v38, %v807_v10  ;;  %v829_v47 = vmul.f32 %v827_v12, %v2072_v44  ;;  %v839_v4 = vstv %s2358_s14  ;;  %v2577_v21 = vld [vmem:[#allocation20_spill] sm:$0xff] }
 0x116   : > { %v988_v11 = vadd.f32 %v986_v29, %v982_v28  ;;  %v930_v24 = vadd.f32 %v928_v17, %v924_v1  ;;  %v821_v42 = vstv %s1161_s9  ;;  %v840_v61 = vmul.f32 %v839_v4, %v2138_v27  ;;  %v2575_v28 = vld [vmem:[#allocation19_spill] sm:$0xff] }
 0x117   : > { %v822_v36 = vmul.f32 %v821_v42, %v1415_v41  ;;  %v823_v43 = vmul.f32 %v821_v42, %v1413_v40  ;;  %v818_v52 = vadd.f32 %v816_v16, %v812_v58  ;;  %v819_v32 = vadd.f32 %v817_v20, %v813_v13 }
 0x118   : > { %992 = vrot.lane.b32.xlu2 %v988_v11, %s1345_s25  ;;  %v936_v51 = vadd.f32 %v934_v31, %v930_v24  ;;  %s2374_s25 = sld [smem:[#allocation6 + $0x17]]  ;;  %v386_v27 = vstv %s1109_s17  ;;  %v390_v14 = vstv %s1110_s18  ;;  %v402_v11 = vstv %s2378_s26 }
 0x119   : > { %v824_v15 = vadd.f32 %v822_v36, %v818_v52  ;;  %v825_v5 = vadd.f32 %v823_v43, %v819_v32  ;;  %v388_v53 = vmul.f32 %v386_v27, %v1746_v60  ;;  %v392_v9 = vmul.f32 %v390_v14, %v1742_v35 }
 0x11a   : > { %940 = vrot.lane.b32.xlu0 %v936_v51, %s1344_s10  ;;  %s1163_s10 = sld [smem:[#allocation6 + $0x4b]]  ;;  %v408_v24 = vstv %s2380_s7  ;;  %v404_v60 = vmul.f32 %v402_v11, %v2576_v46  ;;  %v387_v35 = vmul.f32 %v386_v27, %v1664_v59  ;;  %v391_v34 = vmul.f32 %v390_v14, %v1660_v22 }
 0x11b   : > { %v830_v7 = vadd.f32 %v828_v8, %v824_v15  ;;  %v831_v55 = vadd.f32 %v829_v47, %v825_v5  ;;  %v394_v17 = vadd.f32 %v392_v9, %v388_v53  ;;  %v414_v3 = vstv %s2386_s20 }
 0x11c   : > { %v410_v38 = vmul.f32 %v408_v24, %v2577_v21  ;;  %v416_v13 = vmul.f32 %v414_v3, %v1868_v23  ;;  %v393_v20 = vadd.f32 %v391_v34, %v387_v35  ;;  %v420_v36 = vstv %s2391_s21 }
 0x11d   : > { %v422_v32 = vmul.f32 %v420_v36, %v1671_v39  ;;  %v403_v8 = vmul.f32 %v402_v11, %v1389_v25  ;;  %v409_v47 = vmul.f32 %v408_v24, %v1809_v57 }
 0x11e   : > { %v396_v30 = vstv %s2374_s25 }
 0x11f   : > { %v398_v1 = vmul.f32 %v396_v30, %v2575_v28  ;;  %v397_v59 = vmul.f32 %v396_v30, %v1531_v6 }
 0x120   : > { %v833_v50 = vstv %s1163_s10 }
 0x121   : > { %v834_v41 = vmul.f32 %v833_v50, %v2130_v63  ;;  %v835_v40 = vmul.f32 %v833_v50, %v2134_v62  ;;  %v400_v51 = vadd.f32 %v398_v1, %v394_v17  ;;  %v399_v5 = vadd.f32 %v397_v59, %v393_v20 }
 0x122   : > { %v415_v50 = vmul.f32 %v414_v3, %v1864_v33  ;;  %v421_v33 = vmul.f32 %v420_v36, %v1860_v48  ;;  %v841_v3 = vmul.f32 %v839_v4, %v1947_v54 }
 0x123   : > { %v836_v45 = vadd.f32 %v834_v41, %v830_v7  ;;  %v2363_v2 = vadd.f32 %v835_v40, %v831_v55  ;;  %v406_v58 = vadd.f32 %v404_v60, %v400_v51  ;;  %v405_v55 = vadd.f32 %v403_v8, %v399_v5 }
 0x125   : > { %v2368_v56 = vadd.f32 %v840_v61, %v836_v45  ;;  %v412_v43 = vadd.f32 %v410_v38, %v406_v58  ;;  %v411_v61 = vadd.f32 %v409_v47, %v405_v55  ;;  %v843_v58 = vadd.f32 %v841_v3, %v2363_v2 }
 0x127   : > { %v2370_v0 = vpop.permute.xlu2 %321  ;;  %v418_v52 = vadd.f32 %v416_v13, %v412_v43 }
 0x128   : > { %v329_v25 = vsel %vm325_vm8, 0.0, %v2370_v0 }
 0x129   : > { %v424_v6 = vadd.f32 %v422_v32, %v418_v52 }
 0x12f   : > { %v377_v63 = vpop.permute.xlu2 %376 }
 0x137   : > { %v2388_v29 = vpop.permute.xlu2 %524 }
 0x13e   : > { %v271_v44 = vpop.permute.xlu1 %270 }
 0x13f   : > { %v269_v37 = vpop.permute.xlu0 %268  ;;  %v576_v42 = vpop.permute.xlu2 %575 }
 0x140   : > { %v273_v16 = vsel %vm272_vm9, %v269_v37, %v271_v44  ;;  %v276_v39 = vsel %vm272_vm9, 0.0, %v269_v37  ;;  %v530_v37 = vsel %vm526_vm12, %v2388_v29, 0.0 }
 0x146   : > { %v2372_v19 = vpop.permute.xlu1 %374 }
 0x147   : > { %v324_v18 = vpop.permute.xlu0 %323  ;;  %v379_v15 = vsel %vm378_vm10, %v2372_v19, %v377_v63  ;;  %v382_v57 = vsel %vm378_vm10, 0.0, %v2372_v19  ;;  %v417_v63 = vadd.f32 %v415_v50, %v411_v61 }
 0x148   : > { %v326_v26 = vsel %vm325_vm8, %v2370_v0, %v324_v18  ;;  %v330_v18 = vadd.f32 %v329_v25, %v276_v39 }
 0x149   : > { %v331_v22 = vadd.f32 %v326_v26, %v273_v16  ;;  %v423_v0 = vadd.f32 %v421_v33, %v417_v63 }
 0x14a   : > { %v383_v14 = vadd.f32 %v382_v57, %v330_v18 }
 0x14b   : > { %v384_v23 = vadd.f32 %v379_v15, %v331_v22 }
 0x14c   : > { %v425_v48 = vadd.f32 %v423_v0, %v383_v14 }
 0x14d   : > { %v426_v45 = vadd.f32 %v424_v6, %v384_v23 }
 0x14e   : > { %v2376_v62 = vpop.permute.xlu1 %469  ;;  %v743_v40 = vpop.permute.xlu2 %742 }
 0x14f   : > { %v749_v59 = vsel %vm325_vm8, 0.0, %v743_v40 }
 0x151   : > { %v2382_v49 = vpop.permute.xlu0 %471 }
 0x152   : > { %v477_v41 = vsel %vm473_vm11, %v2382_v49, 0.0  ;;  %v474_v17 = vsel %vm473_vm11, %v2376_v62, %v2382_v49 }
 0x153   : > { %v479_v44 = vadd.f32 %v477_v41, %v426_v45  ;;  %v478_v46 = vadd.f32 %v474_v17, %v425_v48 }
 0x155   : > { %v532_v9 = vadd.f32 %v530_v37, %v479_v44 }
 0x156   : > { %v2394_v31 = vpop.permute.xlu1 %577 }
 0x157   : > { %v583_v53 = vsel %vm579_vm13, %v2394_v31, 0.0  ;;  %v580_v62 = vsel %vm579_vm13, %v576_v42, %v2394_v31 }
 0x158   : > { %v585_v28 = vadd.f32 %v583_v53, %v532_v9 }
 0x159   : > { %v523_v10 = vpop.permute.xlu0 %522 }
 0x15a   : > { %v527_v24 = vsel %vm526_vm12, %v523_v10, %v2388_v29 }
 0x15b   : > { %v797_v11 = vpop.permute.xlu2 %796  ;;  %v531_v35 = vadd.f32 %v527_v24, %v478_v46 }
 0x15d   : > { %v584_v26 = vadd.f32 %v580_v62, %v531_v35 }
 0x166   : > { %v693_v12 = vpop.permute.xlu1 %692  ;;  %v943_v10 = vpop.permute.xlu2 %942 }
 0x167   : > { %v947_v36 = vsel %vm526_vm12, %v943_v10, 0.0 }
 0x168   : > { %v691_v7 = vpop.permute.xlu0 %690 }
 0x169   : > { %v694_v30 = vsel %vm272_vm9, %v691_v7, %v693_v12  ;;  %v697_v49 = vsel %vm272_vm9, 0.0, %v691_v7 }
 0x16a   : > { %v699_v51 = vadd.f32 %v694_v30, %v585_v28  ;;  %v698_v29 = vadd.f32 %v697_v49, %v584_v26  ;;  %v1044_v30 = vld.sshfl [vmem:[#allocation1 + $0x8] sm:$0xff pattern:$0x75316420] }
 0x16c   : > { %v750_v31 = vadd.f32 %v749_v59, %v698_v29 }
 0x16e   : > { %v795_v27 = vpop.permute.xlu1 %794 }
 0x16f   : > { %v798_v21 = vsel %vm378_vm10, %v795_v27, %v797_v11  ;;  %v801_v54 = vsel %vm378_vm10, 0.0, %v795_v27 }
 0x170   : > { %v802_v43 = vadd.f32 %v801_v54, %v750_v31 }
 0x172   : > { %v844_v15 = vadd.f32 %v2368_v56, %v802_v43  ;;  %v993_v47 = vpop.permute.xlu2 %992 }
 0x175   : > { %v745_v19 = vpop.permute.xlu0 %744 }
 0x176   : > { %v746_v1 = vsel %vm325_vm8, %v743_v40, %v745_v19 }
 0x177   : > { %v751_v60 = vadd.f32 %v746_v1, %v699_v51  ;;  %v1043_v51 = vld.sshfl [vmem:[#allocation1] sm:$0xff pattern:$0x75316420] }
 0x179   : > { %v889_v34 = vpop.permute.xlu1 %888  ;;  %v803_v38 = vadd.f32 %v798_v21, %v751_v60 }
 0x17b   : > { %v845_v13 = vadd.f32 %v843_v58, %v803_v38 }
 0x182   : > { %v891_v16 = vpop.permute.xlu0 %890 }
 0x183   : > { %v895_v20 = vsel %vm473_vm11, %v891_v16, 0.0  ;;  %v892_v32 = vsel %vm473_vm11, %v889_v34, %v891_v16 }
 0x184   : > { %v897_v4 = vadd.f32 %v895_v20, %v845_v13  ;;  %v896_v5 = vadd.f32 %v892_v32, %v844_v15 }
 0x186   : > { %v995_v42 = vpop.permute.xlu1 %994  ;;  %v949_v22 = vadd.f32 %v947_v36, %v897_v4 }
 0x187   : > { %v999_v52 = vsel %vm579_vm13, %v995_v42, 0.0  ;;  %v996_v6 = vsel %vm579_vm13, %v993_v47, %v995_v42 }
 0x188   : > { %v1001_v2 = vadd.f32 %v999_v52, %v949_v22 }
 0x18a   : > { %v1187_v12 = vmul.f32 -1.442695, %v1001_v2 }
 0x18c   : > { %1220 = vpow2.f32 %v1187_v12  ;;  %v941_v8 = vpop.permute.xlu0 %940 }
 0x18d   : > { %v944_v23 = vsel %vm526_vm12, %v941_v8, %v943_v10 }
 0x18e   : > { %v948_v7 = vadd.f32 %v944_v23, %v896_v5 }
 0x190   : > { %v1000_v55 = vadd.f32 %v996_v6, %v948_v7 }
 0x192   : > { %v1221_v50 = vpop.eup %1220  ;;  %v1186_v39 = vmul.f32 -1.442695, %v1000_v55 }
 0x193   : > { %v1009_v41 = vadd.f32 1.0, %v1221_v50 }
 0x195   : > { %1222 = vrcp.f32 %v1009_v41  ;;  %v1036_v57 = vand.u32 2147483648, %v1009_v41  ;;  %v1034_v18 = vand.u32 2147483647, %v1009_v41  ;;  %vm1030_vm15 = vweird.f32 %v1009_v41 }
 0x196   : > { %1224 = vpow2.f32 %v1186_v39 }
 0x197   : > { %v1037_v33 = vor.u32 1.1754944e-38, %v1036_v57  ;;  %vm1035_vm2 = vcmp.eq.f32.partialorder %v1034_v18, 8.507059e+37 }
 0x19b   : > { %v1223_v40 = vpop.eup %1222 }
 0x19c   : > { %v1225_v45 = vpop.eup %1224  ;;  %v1026_v61 = vmul.f32 %v1223_v40, %v1009_v41  ;;  %vm1031_vm14 = vweird.f32 %v1223_v40 }
 0x19d   : > { %v1008_v25 = vadd.f32 1.0, %v1225_v45  ;;  %vm1032_vm1 = vmor %vm1030_vm15, %vm1031_vm14 }
 0x19e   : > { %v1027_v56 = vsub.f32 1.0, %v1026_v61 }
 0x19f   : > { %1226 = vrcp.f32 %v1008_v25  ;;  %v1021_v19 = vand.u32 2147483648, %v1008_v25  ;;  %v1019_v28 = vand.u32 2147483647, %v1008_v25  ;;  %vm1015_vm4 = vweird.f32 %v1008_v25 }
 0x1a0   : > { %v1028_v44 = vmul.f32 %v1223_v40, %v1027_v56 }
 0x1a1   : > { %v1022_v11 = vor.u32 1.1754944e-38, %v1021_v19  ;;  %vm1020_vm6 = vcmp.eq.f32.partialorder %v1019_v28, 8.507059e+37 }
 0x1a2   : > { %v1029_v63 = vadd.f32 %v1223_v40, %v1028_v44 }
 0x1a4   : > { %v1033_v27 = vsel %vm1032_vm1, %v1223_v40, %v1029_v63 }
 0x1a5   : > { %v1227_v37 = vpop.eup %1226  ;;  %v1038_v14 = vsel %vm1035_vm2, %v1037_v33, %v1033_v27 }
 0x1a6   : > { %v1011_v53 = vmul.f32 %v1227_v37, %v1008_v25  ;;  %v1041_v9 = vperm.slane %v1038_v14, 0  ;;  %vm1016_vm3 = vweird.f32 %v1227_v37 }
 0x1a7   : > { %vm1017_vm5 = vmor %vm1015_vm4, %vm1016_vm3 }
 0x1a8   : > { %v1012_v0 = vsub.f32 1.0, %v1011_v53  ;;  %v1048_v48 = vmul.f32 %v1044_v30, %v1041_v9 }
 0x1aa   : > { %v1013_v17 = vmul.f32 %v1227_v37, %v1012_v0  ;;  %v1051_v60 = vrot.slane %v1048_v48, 4 }
 0x1ac   : > { %v1014_v1 = vadd.f32 %v1227_v37, %v1013_v17 }
 0x1ae   : > { %v1018_v24 = vsel %vm1017_vm5, %v1227_v37, %v1014_v1 }
 0x1af   : > { %v1023_v46 = vsel %vm1020_vm6, %v1022_v11, %v1018_v24 }
 0x1b0   : > { %v1040_v35 = vperm.slane %v1023_v46, 0 }
 0x1b1   :  { %62 = sbr.rel (!%p60_p0) target bundleno = 22 (0x16), region = 58 }
 0x1b2   : > { %v1047_v34 = vmul.f32 %v1043_v51, %v1040_v35 }
 0x1b4   : > { %v1052_v3 = vsel %vm74_vm0, %v1047_v34, %v1051_v60 }
 0x1b5   : > { %1056 = vst [vmem:[%s1055_s12] sm:$0xff] %v1052_v3 }
 0x1b6   :  { %1069 = dma.vmem_to_hbm [thread:$0]  %s1062_s2, 256, %s1064_s23, [#allocation4], %s2582_s24, %s2582_s24, %s2581_s3  }
 0x1b7   :  { %1322 = dma.done.wait [#allocation4], 256  }
 0x1b8   :  { %1323 = vsyncadd [#allocation4], 4294967040 }
 0x1b9   :  { %1074 = vsyncpa [#allocation3], 1 }
 0x1ba   :  { %1075 = vsyncpa [#allocation8], 1 }
 0x1bb   :  { %1076 = vsyncpa [#allocation4], 1 }
 0x1bc   :  { %1077 = vsyncpa [#allocation5], 1 }

</bundles_post_ra>
